<compile_context>
chip_gen: v7x
topology: tpu7x:2x2x1
jax: 0.10.0
libtpu: 0.0.40
codegen_flags: <defaults>
</compile_context>

<pallas_src>
import functools
import math

import jax
import jax.numpy as jnp
from jax.experimental import pallas as pl
from jax.experimental.pallas import tpu as pltpu

# Keep the XLA reference matmuls in true f32 so they match the f32 Pallas dots.
jax.config.update("jax_default_matmul_precision", "highest")


# ---------------------------------------------------------------------------
# Fused kernel: one grid step == one batch element, whole layer in VMEM.
# ---------------------------------------------------------------------------

def _encoder_layer_kernel(src_ref, pos_ref,
                          wqk_ref, bqk_ref, wv_ref, bv_ref, wo_ref, bo_ref,
                          w1_ref, b1_ref, w2_ref, b2_ref,
                          s1_ref, t1_ref, s2_ref, t2_ref,
                          o_ref, *, nhead, scale):
    src = src_ref[...]                       # [L, D]
    x = src + pos_ref[...]                   # with_pos_embed -> q/k input

    L, D = src.shape
    hd = D // nhead

    # Fused Q|K projection (single [D, 2D] matmul); V uses src (no pos).
    qk = jnp.dot(x, wqk_ref[...], preferred_element_type=jnp.float32) + bqk_ref[...]
    v = jnp.dot(src, wv_ref[...], preferred_element_type=jnp.float32) + bv_ref[...]

    # All heads inside this single grid step (statically unrolled lane slices).
    head_outs = []
    for h in range(nhead):
        qh = qk[:, h * hd:(h + 1) * hd]                 # [L, hd]
        kh = qk[:, D + h * hd:D + (h + 1) * hd]         # [L, hd]
        vh = v[:, h * hd:(h + 1) * hd]                  # [L, hd]
        # q @ k^T without an explicit transpose (contract on the feature dim).
        s = jax.lax.dot_general(qh, kh, (((1,), (1,)), ((), ())),
                                preferred_element_type=jnp.float32) * scale   # [L, L]
        m = jnp.max(s, axis=-1, keepdims=True)
        p = jnp.exp(s - m)
        p = p * pl.reciprocal(jnp.sum(p, axis=-1, keepdims=True))  # stable softmax
        head_outs.append(jnp.dot(p, vh, preferred_element_type=jnp.float32))
    attn = jnp.concatenate(head_outs, axis=-1)          # [L, D]

    # Output projection + fused residual + eval-mode BatchNorm1 (single FMA).
    attn_out = jnp.dot(attn, wo_ref[...], preferred_element_type=jnp.float32) + bo_ref[...]
    h1 = (src + attn_out) * s1_ref[...] + t1_ref[...]

    # FFN (relu) + fused residual + eval-mode BatchNorm2.
    ff = jnp.maximum(
        jnp.dot(h1, w1_ref[...], preferred_element_type=jnp.float32) + b1_ref[...], 0.0)
    ff2 = jnp.dot(ff, w2_ref[...], preferred_element_type=jnp.float32) + b2_ref[...]
    out = (h1 + ff2) * s2_ref[...] + t2_ref[...]

    o_ref[...] = out.astype(o_ref.dtype)


# ---------------------------------------------------------------------------
# Wrapper: TransformerEncoderLayer.forward_post(src, pos), activation='relu'
# ---------------------------------------------------------------------------

def transformer_encoder_layer(src, pos, params, *, nhead, eps=1e-5):
    L, B, D = src.shape
    hd = D // nhead
    scale = 1.0 / math.sqrt(hd)          # static Python float (not a traced value)
    FF = params["w1"].shape[1]

    # Fused Q|K weight / bias (both consume src + pos).
    wqk = jnp.concatenate([params["wq"], params["wk"]], axis=1)           # [D, 2D]
    bqk = jnp.concatenate([params["bq"], params["bk"]]).reshape(1, 2 * D)

    # Eval-mode BatchNorm folded to per-channel scale/shift: y = x*s + t.
    s1v = params["g1"] * jax.lax.rsqrt(params["v1"] + eps)
    t1v = params["be1"] - params["m1"] * s1v
    s2v = params["g2"] * jax.lax.rsqrt(params["v2"] + eps)
    t2v = params["be2"] - params["m2"] * s2v

    # One boundary transpose: [L, B, D] -> [B, L, D] so every grid step works
    # on a lane-dense [L, D] slab of a single batch element.
    src_b = jnp.transpose(src, (1, 0, 2))
    pos_b = jnp.transpose(pos, (1, 0, 2))

    def row(v):
        return v.reshape(1, -1)

    def full_spec(shape):
        zeros = (0,) * len(shape)
        return pl.BlockSpec(shape, lambda b: zeros)   # resident, not re-fetched per step

    out = pl.pallas_call(
        functools.partial(_encoder_layer_kernel, nhead=nhead, scale=scale),
        out_shape=jax.ShapeDtypeStruct((B, L, D), jnp.float32),
        grid=(B,),
        in_specs=[
            pl.BlockSpec((None, L, D), lambda b: (b, 0, 0)),   # src  (per batch elem)
            pl.BlockSpec((None, L, D), lambda b: (b, 0, 0)),   # pos
            full_spec((D, 2 * D)), full_spec((1, 2 * D)),      # wqk, bqk
            full_spec((D, D)), full_spec((1, D)),              # wv, bv
            full_spec((D, D)), full_spec((1, D)),              # wo, bo
            full_spec((D, FF)), full_spec((1, FF)),            # w1, b1
            full_spec((FF, D)), full_spec((1, D)),             # w2, b2
            full_spec((1, D)), full_spec((1, D)),              # bn1 scale, shift
            full_spec((1, D)), full_spec((1, D)),              # bn2 scale, shift
        ],
        out_specs=pl.BlockSpec((None, L, D), lambda b: (b, 0, 0)),
        compiler_params=pltpu.CompilerParams(
            dimension_semantics=("parallel",)),
    )(src_b, pos_b,
      wqk, bqk,
      params["wv"], row(params["bv"]),
      params["wo"], row(params["bo"]),
      params["w1"], row(params["b1"]),
      params["w2"], row(params["b2"]),
      row(s1v), row(t1v), row(s2v), row(t2v))

    return jnp.transpose(out, (1, 0, 2))     # back to [L, B, D]


# ---------------------------------------------------------------------------
# Pure-JAX reference (same math) for correctness check
# ---------------------------------------------------------------------------

def reference(src, pos, params, *, nhead, eps=1e-5):
    L, B, D = src.shape
    hd = D // nhead
    scale = 1.0 / math.sqrt(hd)

    qk_in = (src + pos).reshape(L * B, D)
    v_in = src.reshape(L * B, D)
    q = qk_in @ params["wq"] + params["bq"]
    k = qk_in @ params["wk"] + params["bk"]
    v = v_in @ params["wv"] + params["bv"]

    def to_heads(t):
        return t.reshape(L, B, nhead, hd).transpose(1, 2, 0, 3).reshape(B * nhead, L, hd)

    qh, kh, vh = to_heads(q), to_heads(k), to_heads(v)
    s = jnp.einsum("bqd,bkd->bqk", qh, kh) * scale
    p = jax.nn.softmax(s, axis=-1)
    oh = jnp.einsum("bqk,bkd->bqd", p, vh)
    attn2d = oh.reshape(B, nhead, L, hd).transpose(2, 0, 1, 3).reshape(L * B, D)
    attn_out = attn2d @ params["wo"] + params["bo"]

    def bn(x, g, b, m, vv):
        return g * (x - m) / jnp.sqrt(vv + eps) + b

    src2d = src.reshape(L * B, D)
    h1 = bn(src2d + attn_out, params["g1"], params["be1"], params["m1"], params["v1"])
    ff = jnp.maximum(h1 @ params["w1"] + params["b1"], 0.0)
    ff2 = ff @ params["w2"] + params["b2"]
    out = bn(h1 + ff2, params["g2"], params["be2"], params["m2"], params["v2"])
    return out.reshape(L, B, D)


# ---------------------------------------------------------------------------
# Main
# ---------------------------------------------------------------------------

if __name__ == "__main__":
    L, B, D, H, FF = 8, 2, 32, 4, 64   # seq, batch, d_model, nhead, dim_feedforward

    key = jax.random.PRNGKey(0)
    ks = jax.random.split(key, 20)

    def rnd(k, shape, s=0.1):
        return jax.random.normal(k, shape, dtype=jnp.float32) * s

    params = {
        # attention in/out projections (stored pre-transposed: [in, out])
        "wq": rnd(ks[0], (D, D)),  "bq": rnd(ks[1], (D,)),
        "wk": rnd(ks[2], (D, D)),  "bk": rnd(ks[3], (D,)),
        "wv": rnd(ks[4], (D, D)),  "bv": rnd(ks[5], (D,)),
        "wo": rnd(ks[6], (D, D)),  "bo": rnd(ks[7], (D,)),
        # feed-forward
        "w1": rnd(ks[8], (D, FF)), "b1": rnd(ks[9], (FF,)),
        "w2": rnd(ks[10], (FF, D)), "b2": rnd(ks[11], (D,)),
        # BatchNorm1d #1 (gamma, beta, running_mean, running_var)
        "g1": 1.0 + rnd(ks[12], (D,)), "be1": rnd(ks[13], (D,)),
        "m1": rnd(ks[14], (D,)), "v1": 1.0 + 0.1 * jax.random.uniform(ks[15], (D,)),
        # BatchNorm1d #2
        "g2": 1.0 + rnd(ks[16], (D,)), "be2": rnd(ks[17], (D,)),
        "m2": rnd(ks[18], (D,)), "v2": 1.0 + 0.1 * jax.random.uniform(ks[19], (D,)),
    }

    ksrc, kpos = jax.random.split(jax.random.PRNGKey(1))
    src = jax.random.normal(ksrc, (L, B, D), dtype=jnp.float32)
    pos = jax.random.normal(kpos, (L, B, D), dtype=jnp.float32)

    out = transformer_encoder_layer(src, pos, params, nhead=H)
    out = jax.block_until_ready(out)

    ref = reference(src, pos, params, nhead=H)
    assert out.shape == (L, B, D)
    assert bool(jnp.allclose(out, ref, atol=2e-4, rtol=2e-4)), "mismatch vs reference"

    print("KERNEL_OK")
</pallas_src>

<mosaic_0001>
module attributes {stable_mosaic.version = 11 : i64} {
  func.func @_encoder_layer_kernel(%arg0: i32, %arg1: memref<1x8x32xf32, #tpu.memory_space<vmem>>, %arg2: memref<1x8x32xf32, #tpu.memory_space<vmem>>, %arg3: memref<32x64xf32, #tpu.memory_space<vmem>>, %arg4: memref<1x64xf32, #tpu.memory_space<vmem>>, %arg5: memref<32x32xf32, #tpu.memory_space<vmem>>, %arg6: memref<1x32xf32, #tpu.memory_space<vmem>>, %arg7: memref<32x32xf32, #tpu.memory_space<vmem>>, %arg8: memref<1x32xf32, #tpu.memory_space<vmem>>, %arg9: memref<32x64xf32, #tpu.memory_space<vmem>>, %arg10: memref<1x64xf32, #tpu.memory_space<vmem>>, %arg11: memref<64x32xf32, #tpu.memory_space<vmem>>, %arg12: memref<1x32xf32, #tpu.memory_space<vmem>>, %arg13: memref<1x32xf32, #tpu.memory_space<vmem>>, %arg14: memref<1x32xf32, #tpu.memory_space<vmem>>, %arg15: memref<1x32xf32, #tpu.memory_space<vmem>>, %arg16: memref<1x32xf32, #tpu.memory_space<vmem>>, %arg17: memref<1x8x32xf32, #tpu.memory_space<vmem>>) attributes {dimension_semantics = [#tpu.dimension_semantics<parallel>], iteration_bounds = array<i64: 2>, scalar_prefetch = 0 : i64, scratch_operands = 0 : i64, tpu.core_type = #tpu.core_type<tc>, window_params = [{transform_indices = @transform_0, window_bounds = array<i64: 1, 8, 32>}, {transform_indices = @transform_1, window_bounds = array<i64: 1, 8, 32>}, {pipeline_mode = #tpu.pipeline_mode<synchronous>, transform_indices = @transform_2, window_bounds = array<i64: 32, 64>}, {pipeline_mode = #tpu.pipeline_mode<synchronous>, transform_indices = @transform_3, window_bounds = array<i64: 1, 64>}, {pipeline_mode = #tpu.pipeline_mode<synchronous>, transform_indices = @transform_4, window_bounds = array<i64: 32, 32>}, {pipeline_mode = #tpu.pipeline_mode<synchronous>, transform_indices = @transform_5, window_bounds = array<i64: 1, 32>}, {pipeline_mode = #tpu.pipeline_mode<synchronous>, transform_indices = @transform_6, window_bounds = array<i64: 32, 32>}, {pipeline_mode = #tpu.pipeline_mode<synchronous>, transform_indices = @transform_7, window_bounds = array<i64: 1, 32>}, {pipeline_mode = #tpu.pipeline_mode<synchronous>, transform_indices = @transform_8, window_bounds = array<i64: 32, 64>}, {pipeline_mode = #tpu.pipeline_mode<synchronous>, transform_indices = @transform_9, window_bounds = array<i64: 1, 64>}, {pipeline_mode = #tpu.pipeline_mode<synchronous>, transform_indices = @transform_10, window_bounds = array<i64: 64, 32>}, {pipeline_mode = #tpu.pipeline_mode<synchronous>, transform_indices = @transform_11, window_bounds = array<i64: 1, 32>}, {pipeline_mode = #tpu.pipeline_mode<synchronous>, transform_indices = @transform_12, window_bounds = array<i64: 1, 32>}, {pipeline_mode = #tpu.pipeline_mode<synchronous>, transform_indices = @transform_13, window_bounds = array<i64: 1, 32>}, {pipeline_mode = #tpu.pipeline_mode<synchronous>, transform_indices = @transform_14, window_bounds = array<i64: 1, 32>}, {pipeline_mode = #tpu.pipeline_mode<synchronous>, transform_indices = @transform_15, window_bounds = array<i64: 1, 32>}, {transform_indices = @transform_16, window_bounds = array<i64: 1, 8, 32>}]} {
    %c0 = arith.constant 0 : index
    %c0_0 = arith.constant 0 : index
    %c0_1 = arith.constant 0 : index
    %0 = vector.load %arg1[%c0, %c0_0, %c0_1] : memref<1x8x32xf32, #tpu.memory_space<vmem>>, vector<1x8x32xf32>
    %1 = vector.shape_cast %0 : vector<1x8x32xf32> to vector<8x32xf32>
    %c0_2 = arith.constant 0 : index
    %c0_3 = arith.constant 0 : index
    %c0_4 = arith.constant 0 : index
    %2 = vector.load %arg2[%c0_2, %c0_3, %c0_4] : memref<1x8x32xf32, #tpu.memory_space<vmem>>, vector<1x8x32xf32>
    %3 = vector.shape_cast %2 : vector<1x8x32xf32> to vector<8x32xf32>
    %4 = arith.addf %1, %3 : vector<8x32xf32>
    %c0_5 = arith.constant 0 : index
    %c0_6 = arith.constant 0 : index
    %5 = vector.load %arg3[%c0_5, %c0_6] : memref<32x64xf32, #tpu.memory_space<vmem>>, vector<32x64xf32>
    %cst = arith.constant dense<0.000000e+00> : vector<8x64xf32>
    %6 = tpu.matmul %4, %5, %cst {dimension_numbers = #tpu.dot_dimension_numbers<[1], [0], [0], [1], [0, 0, 1, 1], [], []>, precision = #tpu.contract_precision<fp32>} : vector<8x32xf32>, vector<32x64xf32>, vector<8x64xf32> -> vector<8x64xf32>
    %c0_7 = arith.constant 0 : index
    %c0_8 = arith.constant 0 : index
    %7 = vector.load %arg4[%c0_7, %c0_8] : memref<1x64xf32, #tpu.memory_space<vmem>>, vector<1x64xf32>
    %8 = vector.broadcast %7 : vector<1x64xf32> to vector<8x64xf32>
    %9 = arith.addf %6, %8 : vector<8x64xf32>
    %c0_9 = arith.constant 0 : index
    %c0_10 = arith.constant 0 : index
    %10 = vector.load %arg5[%c0_9, %c0_10] : memref<32x32xf32, #tpu.memory_space<vmem>>, vector<32x32xf32>
    %cst_11 = arith.constant dense<0.000000e+00> : vector<8x32xf32>
    %11 = tpu.matmul %1, %10, %cst_11 {dimension_numbers = #tpu.dot_dimension_numbers<[1], [0], [0], [1], [0, 0, 1, 1], [], []>, precision = #tpu.contract_precision<fp32>} : vector<8x32xf32>, vector<32x32xf32>, vector<8x32xf32> -> vector<8x32xf32>
    %c0_12 = arith.constant 0 : index
    %c0_13 = arith.constant 0 : index
    %12 = vector.load %arg6[%c0_12, %c0_13] : memref<1x32xf32, #tpu.memory_space<vmem>>, vector<1x32xf32>
    %13 = vector.broadcast %12 : vector<1x32xf32> to vector<8x32xf32>
    %14 = arith.addf %11, %13 : vector<8x32xf32>
    %15 = vector.extract_strided_slice %9 {offsets = [0, 0], sizes = [8, 8], strides = [1, 1]} : vector<8x64xf32> to vector<8x8xf32>
    %16 = vector.extract_strided_slice %9 {offsets = [0, 32], sizes = [8, 8], strides = [1, 1]} : vector<8x64xf32> to vector<8x8xf32>
    %17 = vector.extract_strided_slice %14 {offsets = [0, 0], sizes = [8, 8], strides = [1, 1]} : vector<8x32xf32> to vector<8x8xf32>
    %cst_14 = arith.constant dense<0.000000e+00> : vector<8x8xf32>
    %18 = tpu.matmul %15, %16, %cst_14 {dimension_numbers = #tpu.dot_dimension_numbers<[1], [1], [0], [0], [0, 0, 1, 0], [], []>, precision = #tpu.contract_precision<fp32>} : vector<8x8xf32>, vector<8x8xf32>, vector<8x8xf32> -> vector<8x8xf32>
    %cst_15 = arith.constant 0.353553385 : f32
    %19 = vector.broadcast %cst_15 : f32 to vector<8x8xf32>
    %20 = arith.mulf %18, %19 : vector<8x8xf32>
    %cst_16 = arith.constant dense<0xFF800000> : vector<8xf32>
    %21 = vector.multi_reduction <maximumf>, %20, %cst_16 [1] : vector<8x8xf32> to vector<8xf32>
    %22 = vector.shape_cast %21 : vector<8xf32> to vector<8x1xf32>
    %23 = vector.broadcast %22 : vector<8x1xf32> to vector<8x8xf32>
    %24 = arith.subf %20, %23 : vector<8x8xf32>
    %25 = math.exp %24 : vector<8x8xf32>
    %cst_17 = arith.constant dense<0.000000e+00> : vector<8xf32>
    %26 = vector.multi_reduction <add>, %25, %cst_17 [1] : vector<8x8xf32> to vector<8xf32>
    %27 = vector.shape_cast %26 : vector<8xf32> to vector<8x1xf32>
    %28 = tpu.reciprocal %27 : vector<8x1xf32> -> vector<8x1xf32>
    %29 = vector.broadcast %28 : vector<8x1xf32> to vector<8x8xf32>
    %30 = arith.mulf %25, %29 : vector<8x8xf32>
    %cst_18 = arith.constant dense<0.000000e+00> : vector<8x8xf32>
    %31 = tpu.matmul %30, %17, %cst_18 {dimension_numbers = #tpu.dot_dimension_numbers<[1], [0], [0], [1], [0, 0, 1, 1], [], []>, precision = #tpu.contract_precision<fp32>} : vector<8x8xf32>, vector<8x8xf32>, vector<8x8xf32> -> vector<8x8xf32>
    %32 = vector.extract_strided_slice %9 {offsets = [0, 8], sizes = [8, 8], strides = [1, 1]} : vector<8x64xf32> to vector<8x8xf32>
    %33 = vector.extract_strided_slice %9 {offsets = [0, 40], sizes = [8, 8], strides = [1, 1]} : vector<8x64xf32> to vector<8x8xf32>
    %34 = vector.extract_strided_slice %14 {offsets = [0, 8], sizes = [8, 8], strides = [1, 1]} : vector<8x32xf32> to vector<8x8xf32>
    %cst_19 = arith.constant dense<0.000000e+00> : vector<8x8xf32>
    %35 = tpu.matmul %32, %33, %cst_19 {dimension_numbers = #tpu.dot_dimension_numbers<[1], [1], [0], [0], [0, 0, 1, 0], [], []>, precision = #tpu.contract_precision<fp32>} : vector<8x8xf32>, vector<8x8xf32>, vector<8x8xf32> -> vector<8x8xf32>
    %cst_20 = arith.constant 0.353553385 : f32
    %36 = vector.broadcast %cst_20 : f32 to vector<8x8xf32>
    %37 = arith.mulf %35, %36 : vector<8x8xf32>
    %cst_21 = arith.constant dense<0xFF800000> : vector<8xf32>
    %38 = vector.multi_reduction <maximumf>, %37, %cst_21 [1] : vector<8x8xf32> to vector<8xf32>
    %39 = vector.shape_cast %38 : vector<8xf32> to vector<8x1xf32>
    %40 = vector.broadcast %39 : vector<8x1xf32> to vector<8x8xf32>
    %41 = arith.subf %37, %40 : vector<8x8xf32>
    %42 = math.exp %41 : vector<8x8xf32>
    %cst_22 = arith.constant dense<0.000000e+00> : vector<8xf32>
    %43 = vector.multi_reduction <add>, %42, %cst_22 [1] : vector<8x8xf32> to vector<8xf32>
    %44 = vector.shape_cast %43 : vector<8xf32> to vector<8x1xf32>
    %45 = tpu.reciprocal %44 : vector<8x1xf32> -> vector<8x1xf32>
    %46 = vector.broadcast %45 : vector<8x1xf32> to vector<8x8xf32>
    %47 = arith.mulf %42, %46 : vector<8x8xf32>
    %cst_23 = arith.constant dense<0.000000e+00> : vector<8x8xf32>
    %48 = tpu.matmul %47, %34, %cst_23 {dimension_numbers = #tpu.dot_dimension_numbers<[1], [0], [0], [1], [0, 0, 1, 1], [], []>, precision = #tpu.contract_precision<fp32>} : vector<8x8xf32>, vector<8x8xf32>, vector<8x8xf32> -> vector<8x8xf32>
    %49 = vector.extract_strided_slice %9 {offsets = [0, 16], sizes = [8, 8], strides = [1, 1]} : vector<8x64xf32> to vector<8x8xf32>
    %50 = vector.extract_strided_slice %9 {offsets = [0, 48], sizes = [8, 8], strides = [1, 1]} : vector<8x64xf32> to vector<8x8xf32>
    %51 = vector.extract_strided_slice %14 {offsets = [0, 16], sizes = [8, 8], strides = [1, 1]} : vector<8x32xf32> to vector<8x8xf32>
    %cst_24 = arith.constant dense<0.000000e+00> : vector<8x8xf32>
    %52 = tpu.matmul %49, %50, %cst_24 {dimension_numbers = #tpu.dot_dimension_numbers<[1], [1], [0], [0], [0, 0, 1, 0], [], []>, precision = #tpu.contract_precision<fp32>} : vector<8x8xf32>, vector<8x8xf32>, vector<8x8xf32> -> vector<8x8xf32>
    %cst_25 = arith.constant 0.353553385 : f32
    %53 = vector.broadcast %cst_25 : f32 to vector<8x8xf32>
    %54 = arith.mulf %52, %53 : vector<8x8xf32>
    %cst_26 = arith.constant dense<0xFF800000> : vector<8xf32>
    %55 = vector.multi_reduction <maximumf>, %54, %cst_26 [1] : vector<8x8xf32> to vector<8xf32>
    %56 = vector.shape_cast %55 : vector<8xf32> to vector<8x1xf32>
    %57 = vector.broadcast %56 : vector<8x1xf32> to vector<8x8xf32>
    %58 = arith.subf %54, %57 : vector<8x8xf32>
    %59 = math.exp %58 : vector<8x8xf32>
    %cst_27 = arith.constant dense<0.000000e+00> : vector<8xf32>
    %60 = vector.multi_reduction <add>, %59, %cst_27 [1] : vector<8x8xf32> to vector<8xf32>
    %61 = vector.shape_cast %60 : vector<8xf32> to vector<8x1xf32>
    %62 = tpu.reciprocal %61 : vector<8x1xf32> -> vector<8x1xf32>
    %63 = vector.broadcast %62 : vector<8x1xf32> to vector<8x8xf32>
    %64 = arith.mulf %59, %63 : vector<8x8xf32>
    %cst_28 = arith.constant dense<0.000000e+00> : vector<8x8xf32>
    %65 = tpu.matmul %64, %51, %cst_28 {dimension_numbers = #tpu.dot_dimension_numbers<[1], [0], [0], [1], [0, 0, 1, 1], [], []>, precision = #tpu.contract_precision<fp32>} : vector<8x8xf32>, vector<8x8xf32>, vector<8x8xf32> -> vector<8x8xf32>
    %66 = vector.extract_strided_slice %9 {offsets = [0, 24], sizes = [8, 8], strides = [1, 1]} : vector<8x64xf32> to vector<8x8xf32>
    %67 = vector.extract_strided_slice %9 {offsets = [0, 56], sizes = [8, 8], strides = [1, 1]} : vector<8x64xf32> to vector<8x8xf32>
    %68 = vector.extract_strided_slice %14 {offsets = [0, 24], sizes = [8, 8], strides = [1, 1]} : vector<8x32xf32> to vector<8x8xf32>
    %cst_29 = arith.constant dense<0.000000e+00> : vector<8x8xf32>
    %69 = tpu.matmul %66, %67, %cst_29 {dimension_numbers = #tpu.dot_dimension_numbers<[1], [1], [0], [0], [0, 0, 1, 0], [], []>, precision = #tpu.contract_precision<fp32>} : vector<8x8xf32>, vector<8x8xf32>, vector<8x8xf32> -> vector<8x8xf32>
    %cst_30 = arith.constant 0.353553385 : f32
    %70 = vector.broadcast %cst_30 : f32 to vector<8x8xf32>
    %71 = arith.mulf %69, %70 : vector<8x8xf32>
    %cst_31 = arith.constant dense<0xFF800000> : vector<8xf32>
    %72 = vector.multi_reduction <maximumf>, %71, %cst_31 [1] : vector<8x8xf32> to vector<8xf32>
    %73 = vector.shape_cast %72 : vector<8xf32> to vector<8x1xf32>
    %74 = vector.broadcast %73 : vector<8x1xf32> to vector<8x8xf32>
    %75 = arith.subf %71, %74 : vector<8x8xf32>
    %76 = math.exp %75 : vector<8x8xf32>
    %cst_32 = arith.constant dense<0.000000e+00> : vector<8xf32>
    %77 = vector.multi_reduction <add>, %76, %cst_32 [1] : vector<8x8xf32> to vector<8xf32>
    %78 = vector.shape_cast %77 : vector<8xf32> to vector<8x1xf32>
    %79 = tpu.reciprocal %78 : vector<8x1xf32> -> vector<8x1xf32>
    %80 = vector.broadcast %79 : vector<8x1xf32> to vector<8x8xf32>
    %81 = arith.mulf %76, %80 : vector<8x8xf32>
    %cst_33 = arith.constant dense<0.000000e+00> : vector<8x8xf32>
    %82 = tpu.matmul %81, %68, %cst_33 {dimension_numbers = #tpu.dot_dimension_numbers<[1], [0], [0], [1], [0, 0, 1, 1], [], []>, precision = #tpu.contract_precision<fp32>} : vector<8x8xf32>, vector<8x8xf32>, vector<8x8xf32> -> vector<8x8xf32>
    %83 = tpu.concatenate %31, %48, %65, %82 in 1 : vector<8x8xf32>, vector<8x8xf32>, vector<8x8xf32>, vector<8x8xf32> -> vector<8x32xf32>
    %c0_34 = arith.constant 0 : index
    %c0_35 = arith.constant 0 : index
    %84 = vector.load %arg7[%c0_34, %c0_35] : memref<32x32xf32, #tpu.memory_space<vmem>>, vector<32x32xf32>
    %cst_36 = arith.constant dense<0.000000e+00> : vector<8x32xf32>
    %85 = tpu.matmul %83, %84, %cst_36 {dimension_numbers = #tpu.dot_dimension_numbers<[1], [0], [0], [1], [0, 0, 1, 1], [], []>, precision = #tpu.contract_precision<fp32>} : vector<8x32xf32>, vector<32x32xf32>, vector<8x32xf32> -> vector<8x32xf32>
    %c0_37 = arith.constant 0 : index
    %c0_38 = arith.constant 0 : index
    %86 = vector.load %arg8[%c0_37, %c0_38] : memref<1x32xf32, #tpu.memory_space<vmem>>, vector<1x32xf32>
    %87 = vector.broadcast %86 : vector<1x32xf32> to vector<8x32xf32>
    %88 = arith.addf %85, %87 : vector<8x32xf32>
    %89 = arith.addf %1, %88 : vector<8x32xf32>
    %c0_39 = arith.constant 0 : index
    %c0_40 = arith.constant 0 : index
    %90 = vector.load %arg13[%c0_39, %c0_40] : memref<1x32xf32, #tpu.memory_space<vmem>>, vector<1x32xf32>
    %91 = vector.broadcast %90 : vector<1x32xf32> to vector<8x32xf32>
    %92 = arith.mulf %89, %91 : vector<8x32xf32>
    %c0_41 = arith.constant 0 : index
    %c0_42 = arith.constant 0 : index
    %93 = vector.load %arg14[%c0_41, %c0_42] : memref<1x32xf32, #tpu.memory_space<vmem>>, vector<1x32xf32>
    %94 = vector.broadcast %93 : vector<1x32xf32> to vector<8x32xf32>
    %95 = arith.addf %92, %94 : vector<8x32xf32>
    %c0_43 = arith.constant 0 : index
    %c0_44 = arith.constant 0 : index
    %96 = vector.load %arg9[%c0_43, %c0_44] : memref<32x64xf32, #tpu.memory_space<vmem>>, vector<32x64xf32>
    %cst_45 = arith.constant dense<0.000000e+00> : vector<8x64xf32>
    %97 = tpu.matmul %95, %96, %cst_45 {dimension_numbers = #tpu.dot_dimension_numbers<[1], [0], [0], [1], [0, 0, 1, 1], [], []>, precision = #tpu.contract_precision<fp32>} : vector<8x32xf32>, vector<32x64xf32>, vector<8x64xf32> -> vector<8x64xf32>
    %c0_46 = arith.constant 0 : index
    %c0_47 = arith.constant 0 : index
    %98 = vector.load %arg10[%c0_46, %c0_47] : memref<1x64xf32, #tpu.memory_space<vmem>>, vector<1x64xf32>
    %99 = vector.broadcast %98 : vector<1x64xf32> to vector<8x64xf32>
    %100 = arith.addf %97, %99 : vector<8x64xf32>
    %cst_48 = arith.constant 0.000000e+00 : f32
    %101 = vector.broadcast %cst_48 : f32 to vector<8x64xf32>
    %102 = arith.maximumf %100, %101 : vector<8x64xf32>
    %c0_49 = arith.constant 0 : index
    %c0_50 = arith.constant 0 : index
    %103 = vector.load %arg11[%c0_49, %c0_50] : memref<64x32xf32, #tpu.memory_space<vmem>>, vector<64x32xf32>
    %cst_51 = arith.constant dense<0.000000e+00> : vector<8x32xf32>
    %104 = tpu.matmul %102, %103, %cst_51 {dimension_numbers = #tpu.dot_dimension_numbers<[1], [0], [0], [1], [0, 0, 1, 1], [], []>, precision = #tpu.contract_precision<fp32>} : vector<8x64xf32>, vector<64x32xf32>, vector<8x32xf32> -> vector<8x32xf32>
    %c0_52 = arith.constant 0 : index
    %c0_53 = arith.constant 0 : index
    %105 = vector.load %arg12[%c0_52, %c0_53] : memref<1x32xf32, #tpu.memory_space<vmem>>, vector<1x32xf32>
    %106 = vector.broadcast %105 : vector<1x32xf32> to vector<8x32xf32>
    %107 = arith.addf %104, %106 : vector<8x32xf32>
    %108 = arith.addf %95, %107 : vector<8x32xf32>
    %c0_54 = arith.constant 0 : index
    %c0_55 = arith.constant 0 : index
    %109 = vector.load %arg15[%c0_54, %c0_55] : memref<1x32xf32, #tpu.memory_space<vmem>>, vector<1x32xf32>
    %110 = vector.broadcast %109 : vector<1x32xf32> to vector<8x32xf32>
    %111 = arith.mulf %108, %110 : vector<8x32xf32>
    %c0_56 = arith.constant 0 : index
    %c0_57 = arith.constant 0 : index
    %112 = vector.load %arg16[%c0_56, %c0_57] : memref<1x32xf32, #tpu.memory_space<vmem>>, vector<1x32xf32>
    %113 = vector.broadcast %112 : vector<1x32xf32> to vector<8x32xf32>
    %114 = arith.addf %111, %113 : vector<8x32xf32>
    %c0_58 = arith.constant 0 : index
    %c0_59 = arith.constant 0 : index
    %c0_60 = arith.constant 0 : index
    %115 = vector.load %arg17[%c0_58, %c0_59, %c0_60] : memref<1x8x32xf32, #tpu.memory_space<vmem>>, vector<1x8x32xf32>
    %116 = vector.shape_cast %115 : vector<1x8x32xf32> to vector<8x32xf32>
    %117 = vector.shape_cast %114 : vector<8x32xf32> to vector<1x8x32xf32>
    tpu.vector_store %arg17[%c0_58, %c0_59, %c0_60], %117 {strides = array<i32>} : memref<1x8x32xf32, #tpu.memory_space<vmem>>, vector<1x8x32xf32>,
    return
  }
  func.func @transform_0(%arg0: i32) -> (i32, i32, i32) {
    %c0_i32 = arith.constant 0 : i32
    %c0_i32_0 = arith.constant 0 : i32
    %c0_i32_1 = arith.constant 0 : i32
    return %arg0, %c0_i32, %c0_i32_0 : i32, i32, i32
  }
  func.func @transform_1(%arg0: i32) -> (i32, i32, i32) {
    %c0_i32 = arith.constant 0 : i32
    %c0_i32_0 = arith.constant 0 : i32
    %c0_i32_1 = arith.constant 0 : i32
    return %arg0, %c0_i32, %c0_i32_0 : i32, i32, i32
  }
  func.func @transform_2(%arg0: i32) -> (i32, i32) {
    %c0_i32 = arith.constant 0 : i32
    %c0_i32_0 = arith.constant 0 : i32
    %c0_i32_1 = arith.constant 0 : i32
    return %c0_i32, %c0_i32_0 : i32, i32
  }
  func.func @transform_3(%arg0: i32) -> (i32, i32) {
    %c0_i32 = arith.constant 0 : i32
    %c0_i32_0 = arith.constant 0 : i32
    %c0_i32_1 = arith.constant 0 : i32
    return %c0_i32, %c0_i32_0 : i32, i32
  }
  func.func @transform_4(%arg0: i32) -> (i32, i32) {
    %c0_i32 = arith.constant 0 : i32
    %c0_i32_0 = arith.constant 0 : i32
    %c0_i32_1 = arith.constant 0 : i32
    return %c0_i32, %c0_i32_0 : i32, i32
  }
  func.func @transform_5(%arg0: i32) -> (i32, i32) {
    %c0_i32 = arith.constant 0 : i32
    %c0_i32_0 = arith.constant 0 : i32
    %c0_i32_1 = arith.constant 0 : i32
    return %c0_i32, %c0_i32_0 : i32, i32
  }
  func.func @transform_6(%arg0: i32) -> (i32, i32) {
    %c0_i32 = arith.constant 0 : i32
    %c0_i32_0 = arith.constant 0 : i32
    %c0_i32_1 = arith.constant 0 : i32
    return %c0_i32, %c0_i32_0 : i32, i32
  }
  func.func @transform_7(%arg0: i32) -> (i32, i32) {
    %c0_i32 = arith.constant 0 : i32
    %c0_i32_0 = arith.constant 0 : i32
    %c0_i32_1 = arith.constant 0 : i32
    return %c0_i32, %c0_i32_0 : i32, i32
  }
  func.func @transform_8(%arg0: i32) -> (i32, i32) {
    %c0_i32 = arith.constant 0 : i32
    %c0_i32_0 = arith.constant 0 : i32
    %c0_i32_1 = arith.constant 0 : i32
    return %c0_i32, %c0_i32_0 : i32, i32
  }
  func.func @transform_9(%arg0: i32) -> (i32, i32) {
    %c0_i32 = arith.constant 0 : i32
    %c0_i32_0 = arith.constant 0 : i32
    %c0_i32_1 = arith.constant 0 : i32
    return %c0_i32, %c0_i32_0 : i32, i32
  }
  func.func @transform_10(%arg0: i32) -> (i32, i32) {
    %c0_i32 = arith.constant 0 : i32
    %c0_i32_0 = arith.constant 0 : i32
    %c0_i32_1 = arith.constant 0 : i32
    return %c0_i32, %c0_i32_0 : i32, i32
  }
  func.func @transform_11(%arg0: i32) -> (i32, i32) {
    %c0_i32 = arith.constant 0 : i32
    %c0_i32_0 = arith.constant 0 : i32
    %c0_i32_1 = arith.constant 0 : i32
    return %c0_i32, %c0_i32_0 : i32, i32
  }
  func.func @transform_12(%arg0: i32) -> (i32, i32) {
    %c0_i32 = arith.constant 0 : i32
    %c0_i32_0 = arith.constant 0 : i32
    %c0_i32_1 = arith.constant 0 : i32
    return %c0_i32, %c0_i32_0 : i32, i32
  }
  func.func @transform_13(%arg0: i32) -> (i32, i32) {
    %c0_i32 = arith.constant 0 : i32
    %c0_i32_0 = arith.constant 0 : i32
    %c0_i32_1 = arith.constant 0 : i32
    return %c0_i32, %c0_i32_0 : i32, i32
  }
  func.func @transform_14(%arg0: i32) -> (i32, i32) {
    %c0_i32 = arith.constant 0 : i32
    %c0_i32_0 = arith.constant 0 : i32
    %c0_i32_1 = arith.constant 0 : i32
    return %c0_i32, %c0_i32_0 : i32, i32
  }
  func.func @transform_15(%arg0: i32) -> (i32, i32) {
    %c0_i32 = arith.constant 0 : i32
    %c0_i32_0 = arith.constant 0 : i32
    %c0_i32_1 = arith.constant 0 : i32
    return %c0_i32, %c0_i32_0 : i32, i32
  }
  func.func @transform_16(%arg0: i32) -> (i32, i32, i32) {
    %c0_i32 = arith.constant 0 : i32
    %c0_i32_0 = arith.constant 0 : i32
    %c0_i32_1 = arith.constant 0 : i32
    return %arg0, %c0_i32, %c0_i32_0 : i32, i32, i32
  }
}

</mosaic_0001>

<bundles_post_ra>
// kernel: tpu_custom_call.1
= control target key start
LH: loop header
LB: loop body
LE: loop exit
PB: predicated region body
PF: predicated region fallthrough
CT: control target
= control target key end

     0   :  { %s9442_s0 = inlined_call_operand.hbm [shape: f32[2,8,32], index: 0, kind: input, shape index: {}]   ;;  %s9443_s1 = inlined_call_operand.hbm [shape: f32[2,8,32], index: 1, kind: input, shape index: {}]   ;;  %s9444_s2 = inlined_call_operand.vmem [shape: f32[32,64], index: 2, kind: input, shape index: {}]   ;;  %s9445_s3 = inlined_call_operand.vmem [shape: f32[1,64], index: 3, kind: input, shape index: {}]   ;;  %s9446_s4 = inlined_call_operand.vmem [shape: f32[32,32], index: 4, kind: input, shape index: {}]   ;;  %s9447_s5 = inlined_call_operand.vmem [shape: f32[1,32], index: 5, kind: input, shape index: {}]   ;;  %s9448_s6 = inlined_call_operand.vmem [shape: f32[32,32], index: 6, kind: input, shape index: {}]   ;;  %s9449_s7 = inlined_call_operand.vmem [shape: f32[1,32], index: 7, kind: input, shape index: {}]   ;;  %s9450_s8 = inlined_call_operand.hbm [shape: f32[32,64], index: 8, kind: input, shape index: {}]   ;;  %s9451_s9 = inlined_call_operand.vmem [shape: f32[1,64], index: 9, kind: input, shape index: {}]   ;;  %s9452_s10 = inlined_call_operand.vmem [shape: f32[64,32], index: 10, kind: input, shape index: {}]   ;;  %s9453_s11 = inlined_call_operand.vmem [shape: f32[1,32], index: 11, kind: input, shape index: {}]   ;;  %s9454_s12 = inlined_call_operand.vmem [shape: f32[1,32], index: 12, kind: input, shape index: {}]   ;;  %s9455_s13 = inlined_call_operand.vmem [shape: f32[1,32], index: 13, kind: input, shape index: {}]   ;;  %s9456_s14 = inlined_call_operand.vmem [shape: f32[1,32], index: 14, kind: input, shape index: {}]   ;;  %s9457_s15 = inlined_call_operand.vmem [shape: f32[1,32], index: 15, kind: input, shape index: {}]   ;;  %s9458_s16 = inlined_call_operand.hbm [shape: f32[2,8,32], index: 16, kind: output, shape index: {}]  }
   0x1   :  { %9472 = sst [smem:[#allocation19_spill]] %s9442_s0 }
   0x2   :  { %9473 = sst [smem:[#allocation20_spill]] %s9450_s8 }
   0x3   :  { %9474 = sst [smem:[#allocation21_spill]] %s9451_s9 }
   0x4   :  { %9475 = sst [smem:[#allocation22_spill]] %s9453_s11 }
   0x5   :  { %9476 = sst [smem:[#allocation23_spill]] %s9455_s13 }
   0x6   :  { %9477 = sst [smem:[#allocation24_spill]] %s9456_s14 }
   0x7   :  { %9478 = sst [smem:[#allocation25_spill]] %s9457_s15 }
   0x8   :  { %9479 = sst [smem:[#allocation26_spill]] %s9458_s16 }
   0x9   :  { %21 = vsyncpa [#allocation3], 0 }
   0xa   :  { %23 = vsyncpa [#allocation3 + $0x1], 0 }
   0xb   :  { %24 = vsyncpa [#allocation6], 0 }
   0xc   :  { %26 = vsyncpa [#allocation6 + $0x1], 0 }
   0xd   :  { %27 = vsyncpa [#allocation4], 0 }
   0xe   :  { %29 = vsyncpa [#allocation4 + $0x1], 0  ;;  %s8587_s21 = smov 0   ;;  %s8589_s22 = smov 0  }
   0xf   :  { %s8591_s23 = smov 0   ;;  %s8593_s24 = smov 0  }
  0x10 LB: > { %9480 = sst [smem:[#allocation13_spill]] %s8469_s21  ;;  %s8608_s25 = sadd.s32 4294967295, %s8481_s24   ;;  %s8481_s24 = sphi %s8593_s24, %s9511_s24   ;;  %s8477_s23 = sphi %s8591_s23, %s9513_s23   ;;  %s8473_s22 = sphi %s8589_s22, %s9515_s22   ;;  %s8469_s21 = sphi %s8587_s21, %s9514_s21  }
  0x11   : > { %9481 = sst [smem:[#allocation14_spill]] %s8477_s23  ;;  %s6983_s26 = sadd.s32 4294967294, %s8481_s24  }
  0x12   : > { %p55_p0 = scmp.ne.s32.totalorder %s8473_s22, %s8469_s21  ;;  %p9465_p1 = scmp.eq.s32.totalorder %s8608_s25, 0 }
  0x13   : > { %p405_p3 = scmp.eq.s32.totalorder %s6983_s26, 1  ;;  %p6984_p5 = scmp.ge.s32.totalorder %s8481_s24, 1 }
  0x14   : > { %p8617_p4 = por %p9465_p1, %p55_p0  ;;  %p412_p7 = scmp.lt.s32.totalorder %s8481_s24, 3 }
  0x15   : > { %p8622_p6 = por %p405_p3, %p55_p0  ;;  %s8483_s30 = smov [#allocation7]  }
  0x16   : > { %s9482_s27 = scalar_select %p8617_p4, 1, 0 }
  0x17   : > { %s9483_s28 = scalar_select %p8622_p6, 1, 0 }
  0x18   : > { %p8627_p8 = pnand %p6984_p5, %p412_p7  ;;  %s442_s0 = sshll.u32 %s8483_s30, 4  ;;  %s8631_s0 = int_to_ptr.vmem [resolvable:$true] %s442_s0 }
  0x19   : > { %9484 = sst [smem:[#allocation15_spill]] %s9483_s28  ;;  %s8643_s18 = sadd.s32 1, %s8481_s24  }
  0x1a   : > { %s9485_s29 = scalar_select %p8627_p8, 1, 0 }
  0x1b   : > { %p8235_p9 = pneg %p8627_p8  ;;  %9487 = sst [smem:[#allocation16_spill]] %s8643_s18 }
  0x1c   : > { %s42_s19 = sadd.s32 1, %s8477_s23  ;;  %s39_s20 = ssub.s32 %s8481_s24, %s8643_s18 }
  0x1d   : > { %p8638_p11 = pnand %p8235_p9, %p9465_p1  ;;  %s9488_s8 = sld [smem:[#allocation20_spill]] }
  0x1f   : > { %p8321_p13 = pneg %p8638_p11 }
  0x23   : > { %s8319_s30 = scalar_lea.hbm %s9488_s8, 512 }
  0x24   : > { %p8320_p12 = scmp.ne.s32.totalorder %s9488_s8, %s8319_s30  ;;  %p8326_p5 = scmp.lt.u32.totalorder %s8319_s30, %s9488_s8 }
  0x26   : > { %p8322_p0 = pnand %p8321_p13, %p8320_p12 }
  0x28   : > { %p8323_p3 = pneg %p8322_p0 }
  0x2a   : > { %p8328_p7 = pnand %p8326_p5, %p8323_p3 }
  0x2c   : > { %8331 = shalt.err (!%p8328_p7)
}
  0x2d   : > { %s8332_s18 = scalar_lea.vmem %s8631_s0, 512  ;;  %p8340_p2 = scmp.lt.s32.totalorder %s8631_s0, %s8631_s0 }
  0x2e   : > { %p8333_p9 = scmp.ne.s32.totalorder %s8631_s0, %s8332_s18  ;;  %p8341_p6 = scmp.lt.s32.totalorder %s8332_s18, %s8332_s18 }
  0x30   : > { %p8335_p10 = pnand %p8333_p9, %p8321_p13  ;;  %p8342_p4 = por %p8341_p6, %p8340_p2 }
  0x32   : > { %p8336_p1 = pneg %p8335_p10 }
  0x34   : > { %p8343_p8 = pnand %p8342_p4, %p8336_p1 }
  0x36   : > { %8346 = shalt.err (!%p8343_p8)
}
  0x37   : > { %s8484_s16 = smov 128   ;;  %s8485_s14 = smov 8  }
  0x38   : > { %8238 = dma.hbm_to_vmem [thread:$0]  (!%p8638_p11), %s9488_s8, 512, %s8631_s0, [#allocation6], %s8484_s16, %s8484_s16, %s8485_s14  }
  0x39   : > { %p40_p2 = scmp.eq.s32.totalorder %s39_s20, 0  ;;  %p49_p1 = scmp.ne.s32.totalorder %s8477_s23, %s8473_s22 }
  0x3a   : > { %p50_p4 = scmp.eq.s32.totalorder %s8481_s24, 0  ;;  %p8251_p6 = scmp.lt.s32.totalorder %s8481_s24, 2 }
  0x3b   : > { %s8674_s28 = scalar_select %p40_p2, %s8477_s23, %s42_s19  }
  0x3c   : > { %p51_p8 = por %p50_p4, %p49_p1  ;;  %p9490_p10 = scmp.eq.s32.totalorder %s8608_s25, 1 }
  0x3d   : > { %9489 = sst [smem:[#allocation17_spill]] %s8674_s28  ;;  %s477_s26 = sand.u32 1, %s8477_s23  }
  0x3e   : > { %p8678_p12 = por %p9490_p10, %p49_p1  ;;  %s6988_s30 = sshll.u32 %s8481_s24, 7 }
  0x3f   : > { %s8684_s11 = sshll.u32 %s477_s26, 3  ;;  %s9493_s15 = sld [smem:[#allocation19_spill]] }
  0x40   : > { %s9491_s18 = scalar_select %p8678_p12, 1, 0 }
  0x41   : > { %s481_s19 = scalar_lea.vmem [#allocation2], %s8684_s11  ;;  %p8692_p11 = pnand %p8251_p6, %p51_p8 }
  0x42   : > { %9492 = sst [smem:[#allocation18_spill]] %s9491_s18  ;;  %s488_s20 = sshll.u32 %s481_s19, 4  ;;  %s8696_s20 = int_to_ptr.vmem [resolvable:$true] %s488_s20 }
  0x43   : > { %s8701_s9 = scalar_lea.hbm %s9443_s1, %s6988_s30  ;;  %s478_s17 = scalar_lea.sflag [#allocation3], %s477_s26 }
  0x44   : > { %p8349_p0 = pneg %p8692_p11 }
  0x45   : > { %s8689_s0 = scalar_lea.hbm %s9493_s15, %s6988_s30  ;;  %s8352_s23 = scalar_lea.hbm %s9493_s15, 256 }
  0x46   : > { %s8347_s8 = scalar_lea.hbm %s8689_s0, 128  ;;  %p8353_p7 = scmp.lt.u32.totalorder %s8689_s0, %s9493_s15 }
  0x47   : > { %p8348_p13 = scmp.ne.s32.totalorder %s8689_s0, %s8347_s8  ;;  %p8354_p9 = scmp.lt.u32.totalorder %s8352_s23, %s8347_s8 }
  0x48   : > { %p8356_p1 = scmp.lt.u32.totalorder %s8347_s8, %s8689_s0 }
  0x49   : > { %p8350_p3 = pnand %p8349_p0, %p8348_p13  ;;  %p8355_p2 = por %p8354_p9, %p8353_p7 }
  0x4b   : > { %p8351_p5 = pneg %p8350_p3  ;;  %p8357_p4 = por %p8356_p1, %p8355_p2 }
  0x4d   : > { %p8358_p6 = pnand %p8357_p4, %p8351_p5 }
  0x4f   : > { %8361 = shalt.err (!%p8358_p6)
}
  0x50   : > { %s8362_s26 = scalar_lea.vmem %s8696_s20, 128  ;;  %s8486_s28 = smov [#allocation2]  }
  0x51   : > { %p8363_p8 = scmp.ne.s32.totalorder %s8696_s20, %s8362_s26  ;;  %s8367_s30 = sshll.u32 %s8486_s28, 4  ;;  %s8368_s30 = int_to_ptr.vmem [resolvable:$false] %s8367_s30 }
  0x52   : > { %s8369_s13 = scalar_lea.vmem %s8368_s30, 256  ;;  %p8370_p3 = scmp.lt.s32.totalorder %s8696_s20, %s8368_s30 }
  0x53   : > { %p8365_p10 = pnand %p8363_p8, %p8349_p0  ;;  %p8371_p7 = scmp.lt.s32.totalorder %s8369_s13, %s8362_s26 }
  0x55   : > { %p8366_p13 = pneg %p8365_p10  ;;  %p8372_p9 = por %p8371_p7, %p8370_p3 }
  0x57   : > { %p8373_p2 = pnand %p8372_p9, %p8366_p13 }
  0x59   : > { %8376 = shalt.err (!%p8373_p2)
}
  0x5a   : > { %8242 = dma.hbm_to_vmem [thread:$0]  (!%p8692_p11), %s8689_s0, 128, %s8696_s20, %s478_s17  }
  0x5b   : > { %s495_s8 = sand.u32 1, %s8481_s24   ;;  %s499_s23 = scalar_lea.vmem [#allocation5], %s8684_s11 }
  0x5c   : > { %s506_s18 = sshll.u32 %s499_s23, 4  ;;  %s496_s14 = scalar_lea.sflag [#allocation6], %s495_s8  ;;  %s507_s18 = int_to_ptr.vmem [resolvable:$true] %s506_s18 }
  0x5d   : > { %s8377_s21 = scalar_lea.hbm %s8701_s9, 128  ;;  %s8382_s28 = scalar_lea.hbm %s9443_s1, 256 }
  0x5e   : > { %p8378_p5 = scmp.ne.s32.totalorder %s8701_s9, %s8377_s21  ;;  %p8383_p6 = scmp.lt.u32.totalorder %s8701_s9, %s9443_s1 }
  0x5f   : > { %p8384_p8 = scmp.lt.u32.totalorder %s8382_s28, %s8377_s21  ;;  %p8386_p13 = scmp.lt.u32.totalorder %s8377_s21, %s8701_s9 }
  0x60   : > { %p8380_p1 = pnand %p8378_p5, %p8349_p0 }
  0x61   : > { %p8385_p10 = por %p8384_p8, %p8383_p6 }
  0x62   : > { %p8381_p4 = pneg %p8380_p1 }
  0x63   : > { %p8387_p3 = por %p8386_p13, %p8385_p10 }
  0x65   : > { %p8388_p7 = pnand %p8387_p3, %p8381_p4 }
  0x67   : > { %8391 = shalt.err (!%p8388_p7)
}
  0x68   : > { %s8392_s11 = scalar_lea.vmem %s507_s18, 128  ;;  %s8487_s0 = smov [#allocation5]  }
  0x69   : > { %p8393_p9 = scmp.ne.s32.totalorder %s507_s18, %s8392_s11  ;;  %s8397_s20 = sshll.u32 %s8487_s0, 4  ;;  %s8398_s20 = int_to_ptr.vmem [resolvable:$false] %s8397_s20 }
  0x6a   : > { %s8399_s17 = scalar_lea.vmem %s8398_s20, 256  ;;  %p8400_p1 = scmp.lt.s32.totalorder %s507_s18, %s8398_s20 }
  0x6b   : > { %p8395_p2 = pnand %p8393_p9, %p8349_p0  ;;  %p8401_p12 = scmp.lt.s32.totalorder %s8399_s17, %s8392_s11 }
  0x6d   : > { %p8396_p5 = pneg %p8395_p2  ;;  %p8402_p6 = por %p8401_p12, %p8400_p1 }
  0x6f   : > { %p8403_p8 = pnand %p8402_p6, %p8396_p5 }
  0x71   : > { %8406 = shalt.err (!%p8403_p8)
}
  0x72   : > { %8245 = dma.hbm_to_vmem [thread:$0]  (!%p8692_p11), %s8701_s9, 128, %s507_s18, %s496_s14  }
  0x73   : > { %p9495_p4 = scmp.ne.s32.totalorder %s9485_s29, 0 }
  0x74   : > { %s8752_s8 = sand.u32 (!%p9495_p4), 1, %s8473_s22   ;;  %p9496_p12 = scmp.ne.s32.totalorder (!%p9495_p4), %s9482_s27, 0 }
  0x75   : > { %515 = sbr.rel (%p9495_p4) target bundleno = 2408 (0x968), region = 84  ;;  %s8755_s23 = sshll.u32 (!%p9495_p4), %s8752_s8, 3 }
  0x76   : > { %s518_s21 = scalar_lea.sflag (!%p9495_p4), [#allocation3], %s8752_s8  ;;  %s521_s19 = scalar_lea.vmem (!%p9495_p4), [#allocation2], %s8755_s23 }
  0x7c   : > { %8452 = dma.done.wait (%p9496_p12), %s518_s21, 128  }
  0x7d   : > { %8454 = vsyncadd (%p9496_p12), %s518_s21, 4294967168  ;;  %s526_s29 = sand.u32 1, %s8608_s25   ;;  %s530_s9 = scalar_lea.vmem [#allocation5], %s8755_s23 }
  0x7e   : > { %s527_s16 = scalar_lea.sflag [#allocation6], %s526_s29 }
  0x7f   : > { %8456 = dma.done.wait (%p9496_p12), %s527_s16, 128  }
  0x80   : > { %8458 = vsyncadd (%p9496_p12), %s527_s16, 4294967168  ;;  %p9497_p11 = scmp.eq.s32.totalorder %s8608_s25, 0 }
  0x82   : > { %8460 = dma.done.wait (%p9497_p11), [#allocation6], 512   ;;  %p9498_p0 = pmov %p9497_p11 }
  0x83   : > { %v8488_v0 = vmov 0.0|0.0   ;;  %vm8489_vm0 = vmmov 0   ;;  %v8490_v1 = vmov 0.0   ;;  %v591_v2 = vld [vmem:[%s9444_s2] sm:$0xff]  ;;  %v592_v3 = vld [vmem:[%s9444_s2 + $0x8] sm:$0xff]  ;;  %v593_v4 = vld [vmem:[%s9444_s2 + $0x10] sm:$0xff] }
  0x84   : > { %8462 = vsyncadd (%p9498_p0), [#allocation6], 4294966784  ;;  %7903 = vmatprep.subr.bf16.mxu0 %v8488_v0  ;;  %7298 = vmatprep.mubr.msk.f32.mxu0 %vm8489_vm0, %v8490_v1  ;;  %vm602_vm1 = vcmask 261120   ;;  %v607_v5 = vand.u32 4294901760, %v591_v2  ;;  %v610_v6 = vand.u32 4294901760, %v592_v3  ;;  %v594_v7 = vld [vmem:[%s9444_s2 + $0x18] sm:$0xff] }
  0x85   : > { %7897 = vmatprep.subr.bf16.mxu1 %v8488_v0  ;;  %7287 = vmatprep.mubr.msk.f32.mxu1 %vm8489_vm0, %v8490_v1  ;;  %v613_v8 = vand.u32 4294901760, %v593_v4  ;;  %v8793_v9 = vld [vmem:[%s521_s19] sm:$0xff]  ;;  %v589_v10 = vld [vmem:[%s530_s9] sm:$0xff]  ;;  %v616_v11 = vand.u32 4294901760, %v594_v7  ;;  %s8491_s17 = smov 88   ;;  %s8492_s21 = smov 96  }
  0x86   : > { %v590_v12 = vadd.f32 %v589_v10, %v8793_v9  ;;  %v687_v13 = vsub.f32 %v591_v2, %v607_v5  ;;  %v694_v14 = vsub.f32 %v592_v3, %v610_v6  ;;  %v7898_v16 = vpack.c.bf16 %v610_v6, %v607_v5  ;;  %v6996_v45 = vld [vmem:[%s9445_s3] ss:$0 sm:$0xff]  ;;  %s8493_s29 = smov 112   ;;  %s8494_s16 = smov 120  }
  0x87   : > { %v701_v15 = vsub.f32 %v593_v4, %v613_v8  ;;  %v708_v17 = vsub.f32 %v594_v7, %v616_v11  ;;  %v7901_v24 = vpack.c.bf16 %v616_v11, %v613_v8  ;;  %s8495_s9 = smov 104   ;;  %s8496_s27 = smov 80   ;;  %vm1593_vm2 = vcmask 64512  }
  0x88   : > { %v604_v18 = vsel %vm602_vm1, %v590_v12, 0  ;;  %v688_v19 = vand.u32 4294901760, %v687_v13  ;;  %v695_v20 = vand.u32 4294901760, %v694_v14  ;;  %7899 = vmatpush3.bf16.msra.mxu1 %v7898_v16  ;;  %v7910_v39 = vpack.c.bf16 %v694_v14, %v687_v13  ;;  %s8497_s18 = smov 72   ;;  %s8499_s14 = smov 16  }
  0x89   : > { %v702_v21 = vand.u32 4294901760, %v701_v15  ;;  %v675_v22 = vand.u32 4294901760, %v604_v18  ;;  %v709_v23 = vand.u32 4294901760, %v708_v17  ;;  %7900 = vmatprep.subr.bf16.mxu1 %v8488_v0  ;;  %v7913_v40 = vpack.c.bf16 %v708_v17, %v701_v15  ;;  %s8500_s11 = smov 24   ;;  %s9499_s26 = sld [smem:[#allocation23_spill]] }
  0x8a   : > { %v689_v25 = vsub.f32 %v687_v13, %v688_v19  ;;  %v696_v26 = vsub.f32 %v694_v14, %v695_v20  ;;  %v7922_v41 = vpack.c.bf16 %v695_v20, %v688_v19  ;;  %v1103_v19 = vsel %vm602_vm1, %v8793_v9, 0  ;;  %s9501_s28 = sld [smem:[#allocation22_spill]]  ;;  %s9502_s30 = sld [smem:[#allocation18_spill]] }
  0x8b   : > { %v703_v27 = vsub.f32 %v701_v15, %v702_v21  ;;  %v676_v28 = vsub.f32 %v604_v18, %v675_v22  ;;  %v710_v29 = vsub.f32 %v708_v17, %v709_v23  ;;  %v7925_v42 = vpack.c.bf16 %v709_v23, %v702_v21  ;;  %v1092_v17 = vld [vmem:[%s9446_s4 + $0x8] sm:$0xff]  ;;  %v1093_v18 = vld [vmem:[%s9446_s4 + $0x10] sm:$0xff]  ;;  %s9503_s0 = sld [smem:[#allocation24_spill]] }
  0x8c   : > { %v690_v30 = vand.u32 4294901760, %v689_v25  ;;  %v697_v31 = vand.u32 4294901760, %v696_v26  ;;  %7902 = vmatpush3.bf16.msra.mxu1 %v7901_v24  ;;  %v1109_v21 = vand.u32 4294901760, %v1092_v17  ;;  %v1112_v23 = vand.u32 4294901760, %v1093_v18 }
  0x8d   : > { %v704_v32 = vand.u32 4294901760, %v703_v27  ;;  %v677_v33 = vand.u32 4294901760, %v676_v28  ;;  %v711_v34 = vand.u32 4294901760, %v710_v29  ;;  %7933 = vmatprep.subr.bf16.mxu1 %v8488_v0  ;;  %vm5273_vm3 = vcmask 130048  }
  0x8e   : > { %v7904_v35 = vpack.c.bf16 %v697_v31, %v690_v30  ;;  %v8892_v9 = vsub.f32 %v1092_v17, %v1109_v21  ;;  %vm5275_vm4 = vcmask 195584   ;;  %vm6308_vm5 = vcmask 523264  }
  0x8f   : > { %v678_v36 = vsub.f32 %v676_v28, %v677_v33  ;;  %v7907_v37 = vpack.c.bf16 %v711_v34, %v704_v32 }
  0x90   : > { %7905 = vmatpush3.bf16.msra.mxu0 %v7904_v35  ;;  %v1194_v32 = vand.u32 4294901760, %v8892_v9  ;;  %p9506_p13 = scmp.ne.s32.totalorder %s9502_s30, 0 }
  0x91   : > { %v679_v38 = vand.u32 4294901760, %v678_v36  ;;  %7906 = vmatprep.subr.bf16.mxu0 %v8488_v0 }
  0x93   : > { %7288 = vmatmul.mubr.f32.vlgmr.msra.gmra.mrb[0].mxu1 %v679_v38  ;;  %v1195_v38 = vsub.f32 %v8892_v9, %v1194_v32 }
  0x94   : > { %7353 = vmatprep.mubr.msk.f32.mxu1 %vm8489_vm0, %v8490_v1  ;;  %7908 = vmatpush3.bf16.msra.mxu0 %v7907_v37 }
  0x95   : > { %7909 = vmatprep.subr.bf16.mxu0 %v8488_v0 }
  0x97   : > { %7299 = vmatmul.mubr.f32.vlgmr.msra.gmra.mrb[0].mxu0 %v675_v22 }
  0x98   : > { %7911 = vmatpush3.bf16.msra.mxu0 %v7910_v39  ;;  %7309 = vmatprep.mubr.msk.f32.mxu0 %vm8489_vm0, %v8490_v1 }
  0x99   : > { %7912 = vmatprep.subr.bf16.mxu0 %v8488_v0 }
  0x9c   : > { %7914 = vmatpush3.bf16.msra.mxu0 %v7913_v40 }
  0x9d   : > { %7915 = vmatprep.subr.bf16.mxu0 %v8488_v0 }
  0x9f   : > { %7310 = vmatmul.mubr.f32.vlgmr.msra.gmra.mrb[0].mxu0 %v676_v28  ;;  %v8894_v28 = vsub.f32 %v1093_v18, %v1112_v23 }
  0xa0   : > { %7917 = vmatpush3.bf16.msra.mxu0 %v7898_v16  ;;  %7320 = vmatprep.mubr.msk.f32.mxu0 %vm8489_vm0, %v8490_v1 }
  0xa1   : > { %7918 = vmatprep.subr.bf16.mxu0 %v8488_v0 }
  0xa4   : > { %7920 = vmatpush3.bf16.msra.mxu0 %v7901_v24 }
  0xa5   : > { %7921 = vmatprep.subr.bf16.mxu0 %v8488_v0 }
  0xa7   : > { %7321 = vmatmul.mubr.f32.vlgmr.msra.gmra.mrb[0].mxu0 %v677_v33  ;;  %v1201_v33 = vand.u32 4294901760, %v8894_v28 }
  0xa8   : > { %7923 = vmatpush3.bf16.msra.mxu0 %v7922_v41  ;;  %7331 = vmatprep.mubr.msk.f32.mxu0 %vm8489_vm0, %v8490_v1 }
  0xa9   : > { %7924 = vmatprep.subr.bf16.mxu0 %v8488_v0  ;;  %v1202_v39 = vsub.f32 %v8894_v28, %v1201_v33 }
  0xac   : > { %7926 = vmatpush3.bf16.msra.mxu0 %v7925_v42 }
  0xad   : > { %7927 = vmatprep.subr.bf16.mxu0 %v8488_v0 }
  0xaf   : > { %7332 = vmatmul.mubr.f32.vlgmr.msra.gmra.mrb[0].mxu0 %v675_v22 }
  0xb0   : > { %7929 = vmatpush3.bf16.msra.mxu0 %v7898_v16  ;;  %7342 = vmatprep.mubr.msk.f32.mxu0 %vm8489_vm0, %v8490_v1  ;;  %v1091_v16 = vld [vmem:[%s9446_s4] sm:$0xff] }
  0xb1   : > { %7930 = vmatprep.subr.bf16.mxu0 %v8488_v0  ;;  %v1106_v20 = vand.u32 4294901760, %v1091_v16 }
  0xb3   : > { %v8888_v26 = vpack.c.bf16 %v1109_v21, %v1106_v20  ;;  %v8890_v27 = vsub.f32 %v1091_v16, %v1106_v20 }
  0xb4   : > { %7932 = vmatpush3.bf16.msra.mxu0 %v7901_v24  ;;  %v8885_v24 = vand.u32 4294901760, %v1103_v19 }
  0xb5   : > { %7411 = vmatprep.subr.mxu0 %v8490_v1  ;;  %7935 = vmatpush3.bf16.msra.mxu1 %v8888_v26  ;;  %v1187_v31 = vand.u32 4294901760, %v8890_v27 }
  0xb6   : > { %v8899_v30 = vsub.f32 %v1103_v19, %v8885_v24  ;;  %7936 = vmatprep.subr.bf16.mxu1 %v8488_v0 }
  0xb7   : > { %7343 = vmatmul.mubr.f32.vlgmr.msra.gmra.mrb[0].mxu0 %v675_v22  ;;  %v1094_v22 = vld [vmem:[%s9446_s4 + $0x18] sm:$0xff]  ;;  %v1188_v37 = vsub.f32 %v8890_v27, %v1187_v31 }
  0xb8   : > { %7413 = vmatprep.mubr.msk.f32.mxu0 %vm8489_vm0, %v8490_v1  ;;  %v1115_v25 = vand.u32 4294901760, %v1094_v22  ;;  %v1176_v35 = vand.u32 4294901760, %v8899_v30 }
  0xb9   : > { %v1189_v42 = vand.u32 4294901760, %v1188_v37 }
  0xba   : > { %v8896_v29 = vsub.f32 %v1094_v22, %v1115_v25  ;;  %v8906_v34 = vpack.c.bf16 %v1115_v25, %v1112_v23  ;;  %v1177_v40 = vsub.f32 %v8899_v30, %v1176_v35 }
  0xbc   : > { %v1208_v36 = vand.u32 4294901760, %v8896_v29  ;;  %7938 = vmatpush3.bf16.msra.mxu1 %v8906_v34 }
  0xbd   : > { %7939 = vmatprep.subr.bf16.mxu1 %v8488_v0 }
  0xbe   : > { %v1209_v41 = vsub.f32 %v8896_v29, %v1208_v36 }
 0x166   : > { %v681_v43 = vpop.f32.mrb[0].mxu1 }
 0x167   : > { %v7289_v44 = vpop.f32.mrb[1].mxu1  ;;  %v682_v46 = vadd.f32 %v6996_v45, %v681_v43  ;;  %v1196_v43 = vand.u32 4294901760, %v1195_v38  ;;  %v1203_v45 = vand.u32 4294901760, %v1202_v39 }
 0x168   : > { %v1178_v44 = vand.u32 4294901760, %v1177_v40 }
 0x16a   : > { %7354 = vmatmul.mubr.f32.vlgmr.msra.gmra.mrb[2].mxu1 %v1178_v44 }
 0x16b   : > { %7364 = vmatprep.mubr.msk.f32.mxu1 %vm8489_vm0, %v8490_v1 }
 0x18a   : > { %v1087_v47 = vpop.f32.mrb[0].mxu0 }
 0x18b   : > { %v8114_v48 = vadd.f32 %v1087_v47, %v682_v46  ;;  %v7344_v49 = vpop.f32.mrb[1].mxu0  ;;  %v1210_v46 = vand.u32 4294901760, %v1209_v41  ;;  %v7940_v47 = vpack.c.bf16 %v1196_v43, %v1189_v42 }
 0x18c   : > { %v7946_v49 = vpack.c.bf16 %v8892_v9, %v8890_v27 }
 0x18d   : > { %2507 = vrot.lane.b32.xlu1 %v8114_v48, %s8491_s17  ;;  %1591 = vrot.lane.b32.xlu0 %v8114_v48, %s8492_s21  ;;  %v1594_v50 = vsel %vm1593_vm2, %v8114_v48, 0  ;;  %s9504_s21 = sld [smem:[#allocation25_spill]] }
 0x18e   : > { %v1664_v51 = vand.u32 4294901760, %v1594_v50  ;;  %7941 = vmatpush3.bf16.msra.mxu1 %v7940_v47 }
 0x18f   : > { %7942 = vmatprep.subr.bf16.mxu1 %v8488_v0 }
 0x190   : > { %v1665_v52 = vsub.f32 %v1594_v50, %v1664_v51 }
 0x191   : > { %3424 = vrot.lane.b32.xlu1 %v8114_v48, %s8493_s29  ;;  %2505 = vrot.lane.b32.xlu0 %v8114_v48, %s8494_s16 }
 0x192   : > { %v1666_v53 = vand.u32 4294901760, %v1665_v52 }
 0x194   : > { %v1667_v56 = vsub.f32 %v1665_v52, %v1666_v53 }
 0x195   : > { %4342 = vrot.lane.b32.xlu1 %v8114_v48, %s8495_s9  ;;  %3426 = vrot.lane.b32.xlu0 %v8114_v48, %s8496_s27 }
 0x196   : > { %v1668_v59 = vand.u32 4294901760, %v1667_v56 }
 0x199   : > { %4344 = vrot.lane.b32.xlu0 %v8114_v48, %s8497_s18  ;;  %v7943_v48 = vpack.c.bf16 %v1210_v46, %v1203_v45 }
 0x19b   : > { %7944 = vmatpush3.bf16.msra.mxu1 %v7943_v48 }
 0x19c   : > { %7945 = vmatprep.subr.bf16.mxu1 %v8488_v0 }
 0x19e   : > { %7365 = vmatmul.mubr.f32.vlgmr.msra.gmra.mrb[2].mxu1 %v8885_v24 }
 0x19f   : > { %7947 = vmatpush3.bf16.msra.mxu1 %v7946_v49  ;;  %7375 = vmatprep.mubr.msk.f32.mxu1 %vm8489_vm0, %v8490_v1 }
 0x1a0   : > { %7948 = vmatprep.subr.bf16.mxu1 %v8488_v0 }
 0x1ff   : > { %v1592_v54 = vpop.permute.xlu0 %1591  ;;  %v2508_v2 = vpop.permute.xlu1 %2507 }
 0x200   : > { %v1596_v55 = vsel %vm1593_vm2, %v1592_v54, 0  ;;  %v2511_v4 = vsel %vm1593_vm2, %v2508_v2, 0 }
 0x201   : > { %v1599_v57 = vand.u32 4294901760, %v1596_v55  ;;  %v8846_v6 = vand.u32 4294901760, %v2511_v4 }
 0x203   : > { %v1676_v58 = vsub.f32 %v1596_v55, %v1599_v57  ;;  %7412 = vmatpush3.xpose.msra.mxu0 %v1599_v57  ;;  %v2506_v63 = vpop.permute.xlu0 %2505  ;;  %v8852_v8 = vsub.f32 %v2511_v4, %v8846_v6  ;;  %v3425_v50 = vpop.permute.xlu1 %3424 }
 0x204   : > { %7416 = vmatprep.subr.mxu0 %v8490_v1  ;;  %v2509_v3 = vsel %vm1593_vm2, %v2506_v63, 0  ;;  %v7961_v63 = vpack.c.bf16 %v1208_v36, %v1201_v33 }
 0x205   : > { %v1677_v60 = vand.u32 4294901760, %v1676_v58  ;;  %v8843_v5 = vand.u32 4294901760, %v2509_v3  ;;  %v2592_v11 = vand.u32 4294901760, %v8852_v8 }
 0x206   : > { %7414 = vmatmul.mubr.f32.vlgmr.msra.gmra.mrb[2].mxu0 %v1668_v59 }
 0x207   : > { %v1678_v61 = vsub.f32 %v1676_v58, %v1677_v60  ;;  %7418 = vmatprep.mubr.msk.f32.mxu0 %vm8489_vm0, %v8490_v1  ;;  %v8849_v7 = vsub.f32 %v2509_v3, %v8843_v5  ;;  %v2593_v13 = vsub.f32 %v8852_v8, %v2592_v11 }
 0x209   : > { %v1679_v62 = vand.u32 4294901760, %v1678_v61  ;;  %v2581_v10 = vand.u32 4294901760, %v8849_v7  ;;  %v2594_v15 = vand.u32 4294901760, %v2593_v13 }
 0x20b   : > { %7417 = vmatpush3.xpose.msra.mxu0 %v1679_v62  ;;  %v2582_v12 = vsub.f32 %v8849_v7, %v2581_v10 }
 0x20c   : > { %7421 = vmatprep.subr.mxu0 %v8490_v1 }
 0x20d   : > { %v2583_v14 = vand.u32 4294901760, %v2582_v12 }
 0x20e   : > { %7419 = vmatmul.mubr.f32.vlgmr.msra.gmra.mrb[2].mxu0 %v1664_v51 }
 0x20f   : > { %7422 = vmatpush3.xpose.msra.mxu0 %v1676_v58  ;;  %7423 = vmatprep.mubr.msk.f32.mxu0 %vm8489_vm0, %v8490_v1 }
 0x210   : > { %7426 = vmatprep.subr.mxu0 %v8490_v1 }
 0x216   : > { %7424 = vmatmul.mubr.f32.vlgmr.msra.gmra.mrb[2].mxu0 %v1665_v52  ;;  %v7949_v52 = vpack.c.bf16 %v8896_v29, %v8894_v28  ;;  %v6997_v29 = vld [vmem:[%s9447_s5] ss:$0 sm:$0xff] }
 0x217   : > { %7427 = vmatpush3.xpose.msra.mxu0 %v1599_v57  ;;  %7428 = vmatprep.mubr.msk.f32.mxu0 %vm8489_vm0, %v8490_v1 }
 0x218   : > { %7431 = vmatprep.subr.mxu0 %v8490_v1  ;;  %7950 = vmatpush3.bf16.msra.mxu1 %v7949_v52 }
 0x219   : > { %7951 = vmatprep.subr.bf16.mxu1 %v8488_v0 }
 0x21b   : > { %7376 = vmatmul.mubr.f32.vlgmr.msra.gmra.mrb[2].mxu1 %v8899_v30 }
 0x21c   : > { %7953 = vmatpush3.bf16.msra.mxu1 %v8888_v26  ;;  %7386 = vmatprep.mubr.msk.f32.mxu1 %vm8489_vm0, %v8490_v1 }
 0x21d   : > { %7954 = vmatprep.subr.bf16.mxu1 %v8488_v0 }
 0x21e   : > { %7429 = vmatmul.mubr.f32.vlgmr.msra.gmra.mrb[2].mxu0 %v1666_v53  ;;  %v3428_v53 = vsel %vm1593_vm2, %v3425_v50, 0 }
 0x21f   : > { %7432 = vmatpush3.xpose.msra.mxu0 %v1677_v60  ;;  %7433 = vmatprep.mubr.msk.f32.mxu0 %vm8489_vm0, %v8490_v1  ;;  %v8955_v55 = vand.u32 4294901760, %v3428_v53  ;;  %v7958_v60 = vpack.c.bf16 %v1194_v32, %v1187_v31 }
 0x220   : > { %7436 = vmatprep.subr.mxu0 %v8490_v1  ;;  %7956 = vmatpush3.bf16.msra.mxu1 %v8906_v34 }
 0x221   : > { %7957 = vmatprep.subr.bf16.mxu1 %v8488_v0 }
 0x223   : > { %7387 = vmatmul.mubr.f32.vlgmr.msra.gmra.mrb[2].mxu1 %v1176_v35 }
 0x224   : > { %7959 = vmatpush3.bf16.msra.mxu1 %v7958_v60  ;;  %7397 = vmatprep.mubr.msk.f32.mxu1 %vm8489_vm0, %v8490_v1 }
 0x225   : > { %7960 = vmatprep.subr.bf16.mxu1 %v8488_v0 }
 0x226   : > { %7434 = vmatmul.mubr.f32.vlgmr.msra.gmra.mrb[2].mxu0 %v1664_v51 }
 0x227   : > { %7437 = vmatpush3.xpose.msra.mxu0 %v1599_v57  ;;  %7438 = vmatprep.mubr.msk.f32.mxu0 %vm8489_vm0, %v8490_v1  ;;  %v3499_v57 = vsub.f32 %v3428_v53, %v8955_v55 }
 0x228   : > { %7471 = vmatprep.subr.mxu0 %v8490_v1  ;;  %7962 = vmatpush3.bf16.msra.mxu1 %v7961_v63 }
 0x229   : > { %v3500_v59 = vand.u32 4294901760, %v3499_v57  ;;  %7963 = vmatprep.subr.bf16.mxu1 %v8488_v0 }
 0x22b   : > { %v3501_v62 = vsub.f32 %v3499_v57, %v3500_v59  ;;  %7398 = vmatmul.mubr.f32.vlgmr.msra.gmra.mrb[2].mxu1 %v8885_v24 }
 0x22c   : > { %7965 = vmatpush3.bf16.msra.mxu1 %v8888_v26  ;;  %7408 = vmatprep.mubr.msk.f32.mxu1 %vm8489_vm0, %v8490_v1 }
 0x22d   : > { %v3502_v3 = vand.u32 4294901760, %v3501_v62  ;;  %7966 = vmatprep.subr.bf16.mxu1 %v8488_v0 }
 0x22e   : > { %7439 = vmatmul.mubr.f32.vlgmr.msra.gmra.mrb[2].mxu0 %v1664_v51  ;;  %v3427_v51 = vpop.permute.xlu0 %3426 }
 0x22f   : > { %7472 = vmatpush3.xpose.msra.mxu0 %v8846_v6  ;;  %7473 = vmatprep.mubr.msk.f32.mxu0 %vm8489_vm0, %v8490_v1  ;;  %v3430_v54 = vsel %vm1593_vm2, %v3427_v51, 0 }
 0x230   : > { %7476 = vmatprep.subr.mxu0 %v8490_v1  ;;  %v8958_v56 = vand.u32 4294901760, %v3430_v54  ;;  %7968 = vmatpush3.bf16.msra.mxu1 %v8906_v34 }
 0x231   : > { %7441 = vmatprep.subr.mxu1 %v8490_v1 }
 0x232   : > { %7474 = vmatmul.mubr.f32.vlgmr.msra.gmra.mrb[4].mxu0 %v2583_v14  ;;  %v3510_v58 = vsub.f32 %v3430_v54, %v8958_v56 }
 0x233   : > { %7477 = vmatpush3.xpose.msra.mxu0 %v2594_v15  ;;  %7478 = vmatprep.mubr.msk.f32.mxu0 %vm8489_vm0, %v8490_v1 }
 0x234   : > { %7481 = vmatprep.subr.mxu0 %v8490_v1  ;;  %v3511_v61 = vand.u32 4294901760, %v3510_v58  ;;  %7409 = vmatmul.mubr.f32.vlgmr.msra.gmra.mrb[2].mxu1 %v8885_v24 }
 0x235   : > { %7443 = vmatprep.mubr.msk.f32.mxu1 %vm8489_vm0, %v8490_v1 }
 0x236   : > { %v3512_v2 = vsub.f32 %v3510_v58, %v3511_v61 }
 0x238   : > { %v3513_v4 = vand.u32 4294901760, %v3512_v2 }
 0x23a   : > { %7479 = vmatmul.mubr.f32.vlgmr.msra.gmra.mrb[4].mxu0 %v8843_v5 }
 0x23b   : > { %7482 = vmatpush3.xpose.msra.mxu0 %v8852_v8  ;;  %7483 = vmatprep.mubr.msk.f32.mxu0 %vm8489_vm0, %v8490_v1 }
 0x23c   : > { %7486 = vmatprep.subr.mxu0 %v8490_v1 }
 0x242   : > { %7484 = vmatmul.mubr.f32.vlgmr.msra.gmra.mrb[4].mxu0 %v8849_v7 }
 0x243   : > { %7487 = vmatpush3.xpose.msra.mxu0 %v8846_v6  ;;  %7488 = vmatprep.mubr.msk.f32.mxu0 %vm8489_vm0, %v8490_v1 }
 0x244   : > { %7491 = vmatprep.subr.mxu0 %v8490_v1 }
 0x24a   : > { %7489 = vmatmul.mubr.f32.vlgmr.msra.gmra.mrb[4].mxu0 %v2581_v10 }
 0x24b   : > { %7492 = vmatpush3.xpose.msra.mxu0 %v2592_v11  ;;  %7493 = vmatprep.mubr.msk.f32.mxu0 %vm8489_vm0, %v8490_v1 }
 0x24c   : > { %7496 = vmatprep.subr.mxu0 %v8490_v1 }
 0x252   : > { %7494 = vmatmul.mubr.f32.vlgmr.msra.gmra.mrb[4].mxu0 %v8843_v5 }
 0x253   : > { %7497 = vmatpush3.xpose.msra.mxu0 %v8846_v6  ;;  %7498 = vmatprep.mubr.msk.f32.mxu0 %vm8489_vm0, %v8490_v1  ;;  %v4345_v6 = vpop.permute.xlu0 %4344 }
 0x254   : > { %7531 = vmatprep.subr.mxu0 %v8490_v1  ;;  %v4348_v8 = vsel %vm1593_vm2, %v4345_v6, 0 }
 0x255   : > { %v4351_v11 = vand.u32 4294901760, %v4348_v8 }
 0x257   : > { %v4428_v13 = vsub.f32 %v4348_v8, %v4351_v11 }
 0x259   : > { %v4429_v15 = vand.u32 4294901760, %v4428_v13 }
 0x25a   : > { %7499 = vmatmul.mubr.f32.vlgmr.msra.gmra.mrb[4].mxu0 %v8843_v5  ;;  %v4343_v5 = vpop.permute.xlu1 %4342 }
 0x25b   : > { %7532 = vmatpush3.xpose.msra.mxu0 %v8958_v56  ;;  %7533 = vmatprep.mubr.msk.f32.mxu0 %vm8489_vm0, %v8490_v1  ;;  %v4346_v7 = vsel %vm1593_vm2, %v4343_v5, 0  ;;  %v4430_v17 = vsub.f32 %v4428_v13, %v4429_v15 }
 0x25c   : > { %7536 = vmatprep.subr.mxu0 %v8490_v1  ;;  %v4416_v10 = vand.u32 4294901760, %v4346_v7 }
 0x25d   : > { %v4431_v19 = vand.u32 4294901760, %v4430_v17 }
 0x25e   : > { %7534 = vmatmul.mubr.f32.vlgmr.msra.gmra.mrb[6].mxu0 %v3502_v3  ;;  %v4417_v12 = vsub.f32 %v4346_v7, %v4416_v10 }
 0x25f   : > { %7537 = vmatpush3.xpose.msra.mxu0 %v3513_v4  ;;  %7538 = vmatprep.mubr.msk.f32.mxu0 %vm8489_vm0, %v8490_v1 }
 0x260   : > { %7541 = vmatprep.subr.mxu0 %v8490_v1  ;;  %v4418_v14 = vand.u32 4294901760, %v4417_v12 }
 0x262   : > { %v4419_v16 = vsub.f32 %v4417_v12, %v4418_v14 }
 0x264   : > { %v4420_v18 = vand.u32 4294901760, %v4419_v16 }
 0x266   : > { %7539 = vmatmul.mubr.f32.vlgmr.msra.gmra.mrb[6].mxu0 %v8955_v55 }
 0x267   : > { %7542 = vmatpush3.xpose.msra.mxu0 %v3510_v58  ;;  %7543 = vmatprep.mubr.msk.f32.mxu0 %vm8489_vm0, %v8490_v1 }
 0x268   : > { %7546 = vmatprep.subr.mxu0 %v8490_v1 }
 0x26e   : > { %7544 = vmatmul.mubr.f32.vlgmr.msra.gmra.mrb[6].mxu0 %v3499_v57 }
 0x26f   : > { %7547 = vmatpush3.xpose.msra.mxu0 %v8958_v56  ;;  %7548 = vmatprep.mubr.msk.f32.mxu0 %vm8489_vm0, %v8490_v1 }
 0x270   : > { %7551 = vmatprep.subr.mxu0 %v8490_v1 }
 0x276   : > { %7549 = vmatmul.mubr.f32.vlgmr.msra.gmra.mrb[6].mxu0 %v3500_v59 }
 0x277   : > { %7552 = vmatpush3.xpose.msra.mxu0 %v3511_v61  ;;  %7553 = vmatprep.mubr.msk.f32.mxu0 %vm8489_vm0, %v8490_v1 }
 0x278   : > { %7556 = vmatprep.subr.mxu0 %v8490_v1 }
 0x27e   : > { %7554 = vmatmul.mubr.f32.vlgmr.msra.gmra.mrb[6].mxu0 %v8955_v55 }
 0x27f   : > { %7557 = vmatpush3.xpose.msra.mxu0 %v8958_v56  ;;  %7558 = vmatprep.mubr.msk.f32.mxu0 %vm8489_vm0, %v8490_v1 }
 0x280   : > { %7591 = vmatprep.subr.mxu0 %v8490_v1 }
 0x286   : > { %7559 = vmatmul.mubr.f32.vlgmr.msra.gmra.mrb[6].mxu0 %v8955_v55 }
 0x287   : > { %7592 = vmatpush3.xpose.msra.mxu0 %v4351_v11  ;;  %7593 = vmatprep.mubr.msk.f32.mxu0 %vm8489_vm0, %v8490_v1 }
 0x288   : > { %7596 = vmatprep.subr.mxu0 %v8490_v1 }
 0x28a   : > { %7594 = vmatmul.mubr.f32.vlgmr.msra.gmra.mrb[8].mxu0 %v4420_v18 }
 0x28b   : > { %7597 = vmatpush3.xpose.msra.mxu0 %v4431_v19  ;;  %7598 = vmatprep.mubr.msk.f32.mxu0 %vm8489_vm0, %v8490_v1 }
 0x28c   : > { %7601 = vmatprep.subr.mxu0 %v8490_v1 }
 0x292   : > { %7599 = vmatmul.mubr.f32.vlgmr.msra.gmra.mrb[8].mxu0 %v4416_v10 }
 0x293   : > { %7602 = vmatpush3.xpose.msra.mxu0 %v4428_v13  ;;  %7603 = vmatprep.mubr.msk.f32.mxu0 %vm8489_vm0, %v8490_v1 }
 0x294   : > { %7606 = vmatprep.subr.mxu0 %v8490_v1 }
 0x29a   : > { %7604 = vmatmul.mubr.f32.vlgmr.msra.gmra.mrb[8].mxu0 %v4417_v12 }
 0x29b   : > { %7607 = vmatpush3.xpose.msra.mxu0 %v4351_v11  ;;  %7608 = vmatprep.mubr.msk.f32.mxu0 %vm8489_vm0, %v8490_v1 }
 0x29c   : > { %7611 = vmatprep.subr.mxu0 %v8490_v1 }
 0x2a2   : > { %7609 = vmatmul.mubr.f32.vlgmr.msra.gmra.mrb[8].mxu0 %v4418_v14 }
 0x2a3   : > { %7612 = vmatpush3.xpose.msra.mxu0 %v4429_v15  ;;  %7613 = vmatprep.mubr.msk.f32.mxu0 %vm8489_vm0, %v8490_v1 }
 0x2a4   : > { %7616 = vmatprep.subr.mxu0 %v8490_v1 }
 0x2aa   : > { %7614 = vmatmul.mubr.f32.vlgmr.msra.gmra.mrb[8].mxu0 %v4416_v10 }
 0x2ab   : > { %7617 = vmatpush3.xpose.msra.mxu0 %v4351_v11  ;;  %7618 = vmatprep.mubr.msk.f32.mxu0 %vm8489_vm0, %v8490_v1 }
 0x2ac   : > { %7969 = vmatprep.subr.bf16.mxu0 %v8488_v0 }
 0x2b2   : > { %7619 = vmatmul.mubr.f32.vlgmr.msra.gmra.mrb[8].mxu0 %v4416_v10 }
 0x2b3   : > { %7659 = vmatprep.mubr.msk.f32.mxu0 %vm8489_vm0, %v8490_v1 }
 0x301   : > { %v2040_v20 = vpop.f32.mrb[2].mxu0 }
 0x302   : > { %v2044_v21 = vmul.f32 0.35355338, %v2040_v20  ;;  %v7440_v22 = vpop.f32.mrb[3].mxu0 }
 0x304   : > { %v2045_v23 = vsel %vm1593_vm2, %v2044_v21, -inf }
 0x305   : > { %2046 = vmax.xlane.f32.xlu1 %v2045_v23 }
 0x307   : > { %v1586_v9 = vpop.f32.mrb[2].mxu1 }
 0x308   : > { %v7410_v28 = vpop.f32.mrb[3].mxu1  ;;  %v8115_v30 = vadd.f32 %v6997_v29, %v1586_v9 }
 0x30a   : > { %v9049_v31 = vand.u32 4294901760, %v8115_v30 }
 0x30c   : > { %7442 = vmatpush3.msra.mxu1 %v9049_v31  ;;  %v2137_v63 = vsub.f32 %v8115_v30, %v9049_v31 }
 0x30d   : > { %7446 = vmatprep.subr.mxu1 %v8490_v1 }
 0x30e   : > { %v2138_v4 = vand.u32 4294901760, %v2137_v63 }
 0x310   : > { %v2139_v7 = vsub.f32 %v2137_v63, %v2138_v4 }
 0x312   : > { %v2140_v11 = vand.u32 4294901760, %v2139_v7 }
 0x32d   : > { %v2955_v24 = vpop.f32.mrb[4].mxu0 }
 0x32e   : > { %v2959_v25 = vmul.f32 0.35355338, %v2955_v24  ;;  %v7500_v26 = vpop.f32.mrb[5].mxu0 }
 0x330   : > { %v2960_v27 = vsel %vm1593_vm2, %v2959_v25, -inf }
 0x331   : > { %2961 = vmax.xlane.f32.xlu0 %v2960_v27 }
 0x359   : > { %v3874_v32 = vpop.f32.mrb[6].mxu0 }
 0x35a   : > { %v3878_v33 = vmul.f32 0.35355338, %v3874_v32  ;;  %v7560_v34 = vpop.f32.mrb[7].mxu0 }
 0x35c   : > { %v3879_v35 = vsel %vm1593_vm2, %v3878_v33, -inf }
 0x35d   : > { %3880 = vmax.xlane.f32.xlu1 %v3879_v35 }
 0x385   : > { %v4792_v36 = vpop.f32.mrb[8].mxu0 }
 0x386   : > { %v4796_v37 = vmul.f32 0.35355338, %v4792_v36  ;;  %v7620_v38 = vpop.f32.mrb[9].mxu0 }
 0x388   : > { %v4797_v39 = vsel %vm1593_vm2, %v4796_v37, -inf }
 0x389   : > { %4798 = vmax.xlane.f32.xlu1 %v4797_v39 }
 0x392   : > { %v2047_v40 = vpop.xlane.xlu1 %2046 }
 0x393   : > { %v2048_v41 = vsub.f32 %v2044_v21, %v2047_v40 }
 0x395   : > { %v2049_v42 = vmul.f32 1.442695, %v2048_v41 }
 0x397   : > { %8302 = vpow2.f32 %v2049_v42 }
 0x3a1   : > { %v8303_v43 = vpop.eup %8302 }
 0x3a2   : > { %v2051_v44 = vsel %vm1593_vm2, %v8303_v43, 0.0 }
 0x3a3   : > { %2052 = vadd.xlane.f32.xlu0 %v2051_v44 }
 0x3be   : > { %v2962_v45 = vpop.xlane.xlu0 %2961 }
 0x3bf   : > { %v2963_v46 = vsub.f32 %v2959_v25, %v2962_v45 }
 0x3c1   : > { %v2964_v47 = vmul.f32 1.442695, %v2963_v46 }
 0x3c3   : > { %8304 = vpow2.f32 %v2964_v47 }
 0x3cd   : > { %v8305_v48 = vpop.eup %8304 }
 0x3ce   : > { %v2966_v49 = vsel %vm1593_vm2, %v8305_v48, 0.0 }
 0x3cf   : > { %2967 = vadd.xlane.f32.xlu0 %v2966_v49 }
 0x3e5   : > { %2972 = vrot.lane.b32.xlu0 %v8115_v30, %s8494_s16  ;;  %s587_s16 = scalar_lea.vmem [#allocation8], %s8755_s23 }
 0x3ea   : > { %v3881_v50 = vpop.xlane.xlu1 %3880 }
 0x3eb   : > { %v3882_v51 = vsub.f32 %v3878_v33, %v3881_v50 }
 0x3ed   : > { %v3883_v52 = vmul.f32 1.442695, %v3882_v51 }
 0x3ef   : > { %8306 = vpow2.f32 %v3883_v52 }
 0x3f9   : > { %v9058_v53 = vpop.eup %8306 }
 0x3fa   : > { %v3885_v54 = vsel %vm1593_vm2, %v9058_v53, 0.0 }
 0x3fb   : > { %3886 = vadd.xlane.f32.xlu1 %v3885_v54 }
 0x40c   : > { %3890 = vrot.lane.b32.xlu1 %v8115_v30, %s8493_s29  ;;  %s8498_s29 = smov 8  }
 0x410   : > { %4808 = vrot.lane.b32.xlu1 %v8115_v30, %s8495_s9  ;;  %s6881_s9 = sshll.u32 %s587_s16, 4  ;;  %s9399_s9 = int_to_ptr.vmem [resolvable:$true] %s6881_s9 }
 0x416   : > { %v4799_v55 = vpop.xlane.xlu1 %4798 }
 0x417   : > { %v4800_v56 = vsub.f32 %v4796_v37, %v4799_v55 }
 0x419   : > { %v4801_v57 = vmul.f32 1.442695, %v4800_v56 }
 0x41b   : > { %8308 = vpow2.f32 %v4801_v57 }
 0x425   : > { %v9064_v58 = vpop.eup %8308 }
 0x426   : > { %v4803_v59 = vsel %vm1593_vm2, %v9064_v58, 0.0 }
 0x427   : > { %4804 = vadd.xlane.f32.xlu0 %v4803_v59 }
 0x430   : > { %v2053_v60 = vpop.xlane.xlu0 %2052 }
 0x431   : > { %8310 = vrcp.f32 %v2053_v60  ;;  %v5277_v60 = vld [vmem:[%s9448_s6] sm:$0xff] }
 0x43b   : > { %v8311_v61 = vpop.eup %8310 }
 0x43c   : > { %v2055_v62 = vmul.f32 %v8311_v61, %v8303_v43  ;;  %v5278_v61 = vld [vmem:[%s9448_s6 + $0x8] sm:$0xff] }
 0x43e   : > { %v2057_v2 = vsel %vm1593_vm2, %v2055_v62, 0  ;;  %v5292_v62 = vand.u32 4294901760, %v5277_v60 }
 0x43f   : > { %v2125_v3 = vand.u32 4294901760, %v2057_v2 }
 0x441   : > { %v2126_v5 = vsub.f32 %v2057_v2, %v2125_v3  ;;  %v9154_v2 = vsub.f32 %v5277_v60, %v5292_v62 }
 0x443   : > { %v2127_v6 = vand.u32 4294901760, %v2126_v5 }
 0x445   : > { %v2128_v8 = vsub.f32 %v2126_v5, %v2127_v6 }
 0x447   : > { %v2129_v10 = vand.u32 4294901760, %v2128_v8 }
 0x449   : > { %7444 = vmatmul.mubr.f32.vlgmr.msra.gmra.mrb[4].mxu1 %v2129_v10 }
 0x44a   : > { %7447 = vmatpush3.msra.mxu1 %v2140_v11  ;;  %7448 = vmatprep.mubr.msk.f32.mxu1 %vm8489_vm0, %v8490_v1 }
 0x44b   : > { %7451 = vmatprep.subr.mxu1 %v8490_v1 }
 0x451   : > { %7449 = vmatmul.mubr.f32.vlgmr.msra.gmra.mrb[4].mxu1 %v2125_v3 }
 0x452   : > { %7452 = vmatpush3.msra.mxu1 %v2137_v63  ;;  %7453 = vmatprep.mubr.msk.f32.mxu1 %vm8489_vm0, %v8490_v1  ;;  %v5295_v63 = vand.u32 4294901760, %v5278_v61 }
 0x453   : > { %7456 = vmatprep.subr.mxu1 %v8490_v1 }
 0x459   : > { %7454 = vmatmul.mubr.f32.vlgmr.msra.gmra.mrb[4].mxu1 %v2126_v5 }
 0x45a   : > { %7457 = vmatpush3.msra.mxu1 %v9049_v31  ;;  %7458 = vmatprep.mubr.msk.f32.mxu1 %vm8489_vm0, %v8490_v1 }
 0x45b   : > { %7461 = vmatprep.subr.mxu1 %v8490_v1 }
 0x45c   : > { %v2968_v12 = vpop.xlane.xlu0 %2967 }
 0x45d   : > { %8312 = vrcp.f32 %v2968_v12 }
 0x460   : > { %v2973_v13 = vpop.permute.xlu0 %2972 }
 0x461   : > { %7459 = vmatmul.mubr.f32.vlgmr.msra.gmra.mrb[4].mxu1 %v2127_v6  ;;  %v2979_v14 = vand.u32 4294901760, %v2973_v13 }
 0x462   : > { %7462 = vmatpush3.msra.mxu1 %v2138_v4  ;;  %7463 = vmatprep.mubr.msk.f32.mxu1 %vm8489_vm0, %v8490_v1  ;;  %v5373_v4 = vand.u32 4294901760, %v9154_v2 }
 0x463   : > { %7466 = vmatprep.subr.mxu1 %v8490_v1  ;;  %v3056_v17 = vsub.f32 %v2973_v13, %v2979_v14 }
 0x464   : > { %v5374_v6 = vsub.f32 %v9154_v2, %v5373_v4 }
 0x465   : > { %v3057_v20 = vand.u32 4294901760, %v3056_v17 }
 0x466   : > { %v5375_v8 = vand.u32 4294901760, %v5374_v6 }
 0x467   : > { %v8313_v15 = vpop.eup %8312  ;;  %v3058_v23 = vsub.f32 %v3056_v17, %v3057_v20 }
 0x468   : > { %v2970_v16 = vmul.f32 %v8313_v15, %v8305_v48  ;;  %v5280_v15 = vld [vmem:[%s9448_s6 + $0x18] sm:$0xff] }
 0x469   : > { %7464 = vmatmul.mubr.f32.vlgmr.msra.gmra.mrb[4].mxu1 %v2125_v3  ;;  %v3059_v26 = vand.u32 4294901760, %v3058_v23 }
 0x46a   : > { %7467 = vmatpush3.msra.mxu1 %v9049_v31  ;;  %7468 = vmatprep.mubr.msk.f32.mxu1 %vm8489_vm0, %v8490_v1  ;;  %v2976_v18 = vsel %vm1593_vm2, %v2970_v16, 0 }
 0x46b   : > { %7501 = vmatprep.subr.mxu1 %v8490_v1  ;;  %v3044_v19 = vand.u32 4294901760, %v2976_v18 }
 0x46d   : > { %v3045_v21 = vsub.f32 %v2976_v18, %v3044_v19 }
 0x46f   : > { %v3046_v22 = vand.u32 4294901760, %v3045_v21 }
 0x471   : > { %7469 = vmatmul.mubr.f32.vlgmr.msra.gmra.mrb[4].mxu1 %v2125_v3  ;;  %v3047_v24 = vsub.f32 %v3045_v21, %v3046_v22  ;;  %v9156_v3 = vsub.f32 %v5278_v61, %v5295_v63 }
 0x472   : > { %7502 = vmatpush3.msra.mxu1 %v2979_v14  ;;  %7503 = vmatprep.mubr.msk.f32.mxu1 %vm8489_vm0, %v8490_v1 }
 0x473   : > { %7506 = vmatprep.subr.mxu1 %v8490_v1  ;;  %v3048_v25 = vand.u32 4294901760, %v3047_v24  ;;  %v5380_v5 = vand.u32 4294901760, %v9156_v3 }
 0x475   : > { %7504 = vmatmul.mubr.f32.vlgmr.msra.gmra.mrb[6].mxu1 %v3048_v25  ;;  %v5381_v7 = vsub.f32 %v9156_v3, %v5380_v5 }
 0x476   : > { %7507 = vmatpush3.msra.mxu1 %v3059_v26  ;;  %7508 = vmatprep.mubr.msk.f32.mxu1 %vm8489_vm0, %v8490_v1 }
 0x477   : > { %7511 = vmatprep.subr.mxu1 %v8490_v1  ;;  %v5382_v10 = vand.u32 4294901760, %v5381_v7 }
 0x479   : > { %v7976_v11 = vpack.c.bf16 %v5382_v10, %v5375_v8 }
 0x47d   : > { %7509 = vmatmul.mubr.f32.vlgmr.msra.gmra.mrb[6].mxu1 %v3044_v19 }
 0x47e   : > { %7512 = vmatpush3.msra.mxu1 %v3056_v17  ;;  %7513 = vmatprep.mubr.msk.f32.mxu1 %vm8489_vm0, %v8490_v1  ;;  %v5301_v17 = vand.u32 4294901760, %v5280_v15 }
 0x47f   : > { %7516 = vmatprep.subr.mxu1 %v8490_v1 }
 0x485   : > { %7514 = vmatmul.mubr.f32.vlgmr.msra.gmra.mrb[6].mxu1 %v3045_v21 }
 0x486   : > { %7517 = vmatpush3.msra.mxu1 %v2979_v14  ;;  %7518 = vmatprep.mubr.msk.f32.mxu1 %vm8489_vm0, %v8490_v1 }
 0x487   : > { %7521 = vmatprep.subr.mxu1 %v8490_v1 }
 0x488   : > { %v3887_v27 = vpop.xlane.xlu1 %3886 }
 0x489   : > { %8314 = vrcp.f32 %v3887_v27  ;;  %v7970_v27 = vpack.c.bf16 %v5295_v63, %v5292_v62 }
 0x48b   : > { %7971 = vmatpush3.bf16.msra.mxu0 %v7970_v27 }
 0x48c   : > { %v3891_v9 = vpop.permute.xlu1 %3890  ;;  %7972 = vmatprep.subr.bf16.mxu0 %v8488_v0 }
 0x48d   : > { %7519 = vmatmul.mubr.f32.vlgmr.msra.gmra.mrb[6].mxu1 %v3046_v22  ;;  %v3897_v28 = vand.u32 4294901760, %v3891_v9 }
 0x48e   : > { %7522 = vmatpush3.msra.mxu1 %v3057_v20  ;;  %7523 = vmatprep.mubr.msk.f32.mxu1 %vm8489_vm0, %v8490_v1 }
 0x48f   : > { %7526 = vmatprep.subr.mxu1 %v8490_v1  ;;  %v3974_v31 = vsub.f32 %v3891_v9, %v3897_v28 }
 0x490   : > { %v4809_v42 = vpop.permute.xlu1 %4808 }
 0x491   : > { %v3975_v34 = vand.u32 4294901760, %v3974_v31  ;;  %v4815_v43 = vand.u32 4294901760, %v4809_v42 }
 0x493   : > { %v8315_v29 = vpop.eup %8314  ;;  %v3976_v37 = vsub.f32 %v3974_v31, %v3975_v34  ;;  %v4892_v45 = vsub.f32 %v4809_v42, %v4815_v43 }
 0x494   : > { %v3889_v30 = vmul.f32 %v8315_v29, %v9058_v53 }
 0x495   : > { %7524 = vmatmul.mubr.f32.vlgmr.msra.gmra.mrb[6].mxu1 %v3044_v19  ;;  %v3977_v40 = vand.u32 4294901760, %v3976_v37  ;;  %v4893_v49 = vand.u32 4294901760, %v4892_v45 }
 0x496   : > { %7527 = vmatpush3.msra.mxu1 %v2979_v14  ;;  %7528 = vmatprep.mubr.msk.f32.mxu1 %vm8489_vm0, %v8490_v1  ;;  %v3894_v32 = vsel %vm1593_vm2, %v3889_v30, 0  ;;  %v5279_v14 = vld [vmem:[%s9448_s6 + $0x10] sm:$0xff] }
 0x497   : > { %7561 = vmatprep.subr.mxu1 %v8490_v1  ;;  %v3962_v33 = vand.u32 4294901760, %v3894_v32  ;;  %v4894_v52 = vsub.f32 %v4892_v45, %v4893_v49  ;;  %v5298_v16 = vand.u32 4294901760, %v5279_v14 }
 0x499   : > { %v3963_v35 = vsub.f32 %v3894_v32, %v3962_v33  ;;  %v4895_v55 = vand.u32 4294901760, %v4894_v52  ;;  %v5386_v18 = vsub.f32 %v5279_v14, %v5298_v16  ;;  %v7973_v9 = vpack.c.bf16 %v5301_v17, %v5298_v16 }
 0x49a   : > { %v7994_v32 = vpack.c.bf16 %v5380_v5, %v5373_v4 }
 0x49b   : > { %v3964_v36 = vand.u32 4294901760, %v3963_v35  ;;  %v5387_v20 = vand.u32 4294901760, %v5386_v18  ;;  %7974 = vmatpush3.bf16.msra.mxu0 %v7973_v9 }
 0x49c   : > { %7981 = vmatprep.subr.bf16.mxu0 %v8488_v0 }
 0x49d   : > { %7529 = vmatmul.mubr.f32.vlgmr.msra.gmra.mrb[6].mxu1 %v3044_v19  ;;  %v3965_v38 = vsub.f32 %v3963_v35, %v3964_v36  ;;  %v5393_v19 = vsub.f32 %v5280_v15, %v5301_v17  ;;  %v5388_v22 = vsub.f32 %v5386_v18, %v5387_v20  ;;  %v6293_v17 = vld [vmem:[%s9452_s10] sm:$0xff] }
 0x49e   : > { %7562 = vmatpush3.msra.mxu1 %v3897_v28  ;;  %7563 = vmatprep.mubr.msk.f32.mxu1 %vm8489_vm0, %v8490_v1 }
 0x49f   : > { %7566 = vmatprep.subr.mxu1 %v8490_v1  ;;  %v3966_v39 = vand.u32 4294901760, %v3965_v38  ;;  %v5394_v21 = vand.u32 4294901760, %v5393_v19  ;;  %v5389_v24 = vand.u32 4294901760, %v5388_v22 }
 0x4a1   : > { %7564 = vmatmul.mubr.f32.vlgmr.msra.gmra.mrb[8].mxu1 %v3966_v39  ;;  %v5395_v23 = vsub.f32 %v5393_v19, %v5394_v21 }
 0x4a2   : > { %7567 = vmatpush3.msra.mxu1 %v3977_v40  ;;  %7568 = vmatprep.mubr.msk.f32.mxu1 %vm8489_vm0, %v8490_v1 }
 0x4a3   : > { %7571 = vmatprep.subr.mxu1 %v8490_v1  ;;  %v5396_v25 = vand.u32 4294901760, %v5395_v23 }
 0x4a5   : > { %v7979_v26 = vpack.c.bf16 %v5396_v25, %v5389_v24 }
 0x4a9   : > { %7569 = vmatmul.mubr.f32.vlgmr.msra.gmra.mrb[8].mxu1 %v3962_v33 }
 0x4aa   : > { %7572 = vmatpush3.msra.mxu1 %v3974_v31  ;;  %7573 = vmatprep.mubr.msk.f32.mxu1 %vm8489_vm0, %v8490_v1  ;;  %v7985_v31 = vpack.c.bf16 %v5393_v19, %v5386_v18  ;;  %v6294_v18 = vld [vmem:[%s9452_s10 + $0x8] sm:$0xff]  ;;  %v6313_v19 = vand.u32 4294901760, %v6293_v17 }
 0x4ab   : > { %7576 = vmatprep.subr.mxu1 %v8490_v1 }
 0x4ac   : > { %v9232_v22 = vsub.f32 %v6293_v17, %v6313_v19 }
 0x4b1   : > { %7574 = vmatmul.mubr.f32.vlgmr.msra.gmra.mrb[8].mxu1 %v3963_v35 }
 0x4b2   : > { %7577 = vmatpush3.msra.mxu1 %v3897_v28  ;;  %7578 = vmatprep.mubr.msk.f32.mxu1 %vm8489_vm0, %v8490_v1 }
 0x4b3   : > { %7581 = vmatprep.subr.mxu1 %v8490_v1 }
 0x4b4   : > { %v4805_v41 = vpop.xlane.xlu0 %4804 }
 0x4b5   : > { %8316 = vrcp.f32 %v4805_v41 }
 0x4b9   : > { %7579 = vmatmul.mubr.f32.vlgmr.msra.gmra.mrb[8].mxu1 %v3964_v36 }
 0x4ba   : > { %7582 = vmatpush3.msra.mxu1 %v3975_v34  ;;  %7583 = vmatprep.mubr.msk.f32.mxu1 %vm8489_vm0, %v8490_v1 }
 0x4bb   : > { %7586 = vmatprep.subr.mxu1 %v8490_v1 }
 0x4bf   : > { %v8317_v44 = vpop.eup %8316 }
 0x4c0   : > { %v4807_v46 = vmul.f32 %v8317_v44, %v9064_v58 }
 0x4c1   : > { %7584 = vmatmul.mubr.f32.vlgmr.msra.gmra.mrb[8].mxu1 %v3962_v33 }
 0x4c2   : > { %v4812_v47 = vsel %vm1593_vm2, %v4807_v46, 0  ;;  %7587 = vmatpush3.msra.mxu1 %v3897_v28  ;;  %7588 = vmatprep.mubr.msk.f32.mxu1 %vm8489_vm0, %v8490_v1  ;;  %v7982_v28 = vpack.c.bf16 %v9156_v3, %v9154_v2  ;;  %v5793_v46 = vld [vmem:[#allocation7] sm:$0xff] }
 0x4c3   : > { %v4880_v48 = vand.u32 4294901760, %v4812_v47  ;;  %7621 = vmatprep.subr.mxu1 %v8490_v1 }
 0x4c5   : > { %v4881_v50 = vsub.f32 %v4812_v47, %v4880_v48  ;;  %v5794_v47 = vld [vmem:[#allocation7 + $0x8] sm:$0xff] }
 0x4c7   : > { %v4882_v51 = vand.u32 4294901760, %v4881_v50 }
 0x4c9   : > { %7589 = vmatmul.mubr.f32.vlgmr.msra.gmra.mrb[8].mxu1 %v3962_v33  ;;  %v4883_v53 = vsub.f32 %v4881_v50, %v4882_v51  ;;  %v7997_v33 = vpack.c.bf16 %v5394_v21, %v5387_v20  ;;  %v6316_v20 = vand.u32 4294901760, %v6294_v18 }
 0x4ca   : > { %7622 = vmatpush3.msra.mxu1 %v4815_v43  ;;  %7623 = vmatprep.mubr.msk.f32.mxu1 %vm8489_vm0, %v8490_v1 }
 0x4cb   : > { %7626 = vmatprep.subr.mxu1 %v8490_v1  ;;  %v4884_v54 = vand.u32 4294901760, %v4883_v53  ;;  %v5795_v53 = vld [vmem:[#allocation7 + $0x10] sm:$0xff]  ;;  %v9230_v21 = vpack.c.bf16 %v6316_v20, %v6313_v19  ;;  %v9234_v23 = vsub.f32 %v6294_v18, %v6316_v20 }
 0x4cd   : > { %7624 = vmatmul.mubr.f32.vlgmr.msra.gmra.mrb[10].mxu1 %v4884_v54  ;;  %v5796_v54 = vld [vmem:[#allocation7 + $0x18] sm:$0xff] }
 0x4ce   : > { %7627 = vmatpush3.msra.mxu1 %v4895_v55  ;;  %7628 = vmatprep.mubr.msk.f32.mxu1 %vm8489_vm0, %v8490_v1  ;;  %v5814_v55 = vand.u32 4294901760, %v5795_v53 }
 0x4cf   : > { %7631 = vmatprep.subr.mxu1 %v8490_v1 }
 0x4d0   : > { %v9208_v60 = vsub.f32 %v5795_v53, %v5814_v55 }
 0x4d2   : > { %v5903_v3 = vand.u32 4294901760, %v9208_v60 }
 0x4d4   : > { %v5904_v6 = vsub.f32 %v9208_v60, %v5903_v3 }
 0x4d5   : > { %7629 = vmatmul.mubr.f32.vlgmr.msra.gmra.mrb[10].mxu1 %v4880_v48 }
 0x4d6   : > { %7632 = vmatpush3.msra.mxu1 %v4892_v45  ;;  %7633 = vmatprep.mubr.msk.f32.mxu1 %vm8489_vm0, %v8490_v1  ;;  %v5905_v10 = vand.u32 4294901760, %v5904_v6 }
 0x4d7   : > { %7636 = vmatprep.subr.mxu1 %v8490_v1 }
 0x4dd   : > { %7634 = vmatmul.mubr.f32.vlgmr.msra.gmra.mrb[10].mxu1 %v4881_v50 }
 0x4de   : > { %7637 = vmatpush3.msra.mxu1 %v4815_v43  ;;  %7638 = vmatprep.mubr.msk.f32.mxu1 %vm8489_vm0, %v8490_v1 }
 0x4df   : > { %7641 = vmatprep.subr.mxu1 %v8490_v1 }
 0x4e5   : > { %7639 = vmatmul.mubr.f32.vlgmr.msra.gmra.mrb[10].mxu1 %v4882_v51 }
 0x4e6   : > { %7642 = vmatpush3.msra.mxu1 %v4893_v49  ;;  %7643 = vmatprep.mubr.msk.f32.mxu1 %vm8489_vm0, %v8490_v1  ;;  %v5811_v49 = vand.u32 4294901760, %v5794_v47 }
 0x4e7   : > { %7646 = vmatprep.subr.mxu1 %v8490_v1 }
 0x4e8   : > { %v9200_v52 = vsub.f32 %v5794_v47, %v5811_v49 }
 0x4ed   : > { %7644 = vmatmul.mubr.f32.vlgmr.msra.gmra.mrb[10].mxu1 %v4880_v48 }
 0x4ee   : > { %7647 = vmatpush3.msra.mxu1 %v4815_v43  ;;  %7648 = vmatprep.mubr.msk.f32.mxu1 %vm8489_vm0, %v8490_v1 }
 0x4ef   : > { %7975 = vmatprep.subr.bf16.mxu1 %v8488_v0 }
 0x4f5   : > { %7649 = vmatmul.mubr.f32.vlgmr.msra.gmra.mrb[10].mxu1 %v4880_v48  ;;  %v5808_v48 = vand.u32 4294901760, %v5793_v46 }
 0x4f6   : > { %7670 = vmatprep.mubr.msk.f32.mxu1 %vm8489_vm0, %v8490_v1  ;;  %7977 = vmatpush3.bf16.msra.mxu1 %v7976_v11 }
 0x4f7   : > { %7978 = vmatprep.subr.bf16.mxu1 %v8488_v0  ;;  %v9196_v50 = vpack.c.bf16 %v5811_v49, %v5808_v48  ;;  %v9198_v51 = vsub.f32 %v5793_v46, %v5808_v48 }
 0x4fa   : > { %7980 = vmatpush3.bf16.msra.mxu1 %v7979_v26  ;;  %v6998_v26 = vld [vmem:[%s9449_s7] ss:$0 sm:$0xff] }
 0x4fb   : > { %7987 = vmatprep.subr.bf16.mxu1 %v8488_v0 }
 0x544   : > { %v2501_v56 = vpop.f32.mrb[4].mxu1 }
 0x545   : > { %v7470_v57 = vpop.f32.mrb[5].mxu1 }
 0x546   : > { %v5889_v57 = vand.u32 4294901760, %v9198_v51 }
 0x548   : > { %v5890_v62 = vsub.f32 %v9198_v51, %v5889_v57 }
 0x54a   : > { %v5891_v2 = vand.u32 4294901760, %v5890_v62 }
 0x570   : > { %v3420_v58 = vpop.f32.mrb[6].mxu1 }
 0x571   : > { %5261 = vrot.lane.b32.xlu1 %v3420_v58, %s8498_s29  ;;  %v7530_v59 = vpop.f32.mrb[7].mxu1  ;;  %v5896_v58 = vand.u32 4294901760, %v9200_v52  ;;  %s7006_s29 = sshll.u32 %s8608_s25, 7  ;;  %s8501_s25 = smov [#allocation8]  }
 0x572   : > { %s8411_s23 = sshll.u32 %s8501_s25, 4  ;;  %s8412_s23 = int_to_ptr.vmem [resolvable:$false] %s8411_s23 }
 0x573   : > { %v5897_v63 = vsub.f32 %v9200_v52, %v5896_v58  ;;  %v8030_v15 = vpack.c.bf16 %v5896_v58, %v5889_v57  ;;  %s8413_s13 = scalar_lea.vmem %s8412_s23, 256  ;;  %p8414_p9 = scmp.lt.s32.totalorder %s9399_s9, %s8412_s23 }
 0x575   : > { %v5898_v5 = vand.u32 4294901760, %v5897_v63 }
 0x577   : > { %v8012_v8 = vpack.c.bf16 %v5898_v5, %v5891_v2  ;;  %v6299_v2 = vld [vmem:[%s9452_s10 + $0x30] sm:$0xff] }
 0x59c   : > { %v4338_v12 = vpop.f32.mrb[8].mxu1 }
 0x59d   : > { %5265 = vrot.lane.b32.xlu1 %v4338_v12, %s8499_s14  ;;  %v7590_v13 = vpop.f32.mrb[9].mxu1  ;;  %s9500_s14 = sld [smem:[#allocation21_spill]] }
 0x59e   : > { %v8018_v13 = vpack.c.bf16 %v9200_v52, %v9198_v51 }
 0x5c8   : > { %v5256_v29 = vpop.f32.mrb[10].mxu1 }
 0x5c9   : > { %5269 = vrot.lane.b32.xlu1 %v5256_v29, %s8500_s11  ;;  %v7650_v30 = vpop.f32.mrb[11].mxu1 }
 0x5e3   : > { %v5262_v34 = vpop.permute.xlu1 %5261 }
 0x5e4   : > { %v5272_v36 = vsel %vm1593_vm2, %v2501_v56, %v5262_v34  ;;  %v5817_v56 = vand.u32 4294901760, %v5796_v54 }
 0x5e6   : > { %v9206_v59 = vpack.c.bf16 %v5817_v56, %v5814_v55  ;;  %v9210_v61 = vsub.f32 %v5796_v54, %v5817_v56  ;;  %v6296_v55 = vld [vmem:[%s9452_s10 + $0x18] sm:$0xff] }
 0x5e7   : > { %v6322_v57 = vand.u32 4294901760, %v6296_v55 }
 0x5e8   : > { %v5910_v4 = vand.u32 4294901760, %v9210_v61  ;;  %v8021_v14 = vpack.c.bf16 %v9210_v61, %v9208_v60  ;;  %v6298_v60 = vld [vmem:[%s9452_s10 + $0x28] sm:$0xff] }
 0x5e9   : > { %v6328_v62 = vand.u32 4294901760, %v6298_v60 }
 0x5ea   : > { %v5911_v7 = vsub.f32 %v9210_v61, %v5910_v4  ;;  %v8033_v16 = vpack.c.bf16 %v5910_v4, %v5903_v3  ;;  %v6300_v3 = vld [vmem:[%s9452_s10 + $0x38] sm:$0xff]  ;;  %v6331_v4 = vand.u32 4294901760, %v6299_v2 }
 0x5eb   : > { %v6334_v5 = vand.u32 4294901760, %v6300_v3 }
 0x5ec   : > { %v5912_v11 = vand.u32 4294901760, %v5911_v7 }
 0x5ed   : > { %v9311_v6 = vpack.c.bf16 %v6334_v5, %v6331_v4 }
 0x5ee   : > { %v8015_v12 = vpack.c.bf16 %v5912_v11, %v5905_v10  ;;  %v9319_v11 = vsub.f32 %v6298_v60, %v6328_v62 }
 0x60f   : > { %v5266_v35 = vpop.permute.xlu1 %5265 }
 0x610   : > { %v5274_v37 = vsel %vm5273_vm3, %v5272_v36, %v5266_v35 }
 0x63b   : > { %v5270_v38 = vpop.permute.xlu1 %5269 }
 0x63c   : > { %v5276_v39 = vsel %vm5275_vm4, %v5274_v37, %v5270_v38 }
 0x63d   : > { %v5289_v40 = vsel %vm602_vm1, %v5276_v39, 0 }
 0x63e   : > { %v5360_v41 = vand.u32 4294901760, %v5289_v40 }
 0x640   : > { %v5361_v42 = vsub.f32 %v5289_v40, %v5360_v41  ;;  %7671 = vmatmul.mubr.f32.vlgmr.msra.gmra.mrb[12].mxu1 %v5360_v41 }
 0x641   : > { %7989 = vmatpush3.bf16.msra.mxu1 %v7970_v27  ;;  %7692 = vmatprep.mubr.msk.f32.mxu1 %vm8489_vm0, %v8490_v1 }
 0x642   : > { %7990 = vmatprep.subr.bf16.mxu1 %v8488_v0  ;;  %v5362_v43 = vand.u32 4294901760, %v5361_v42 }
 0x644   : > { %v5363_v44 = vsub.f32 %v5361_v42, %v5362_v43 }
 0x645   : > { %7992 = vmatpush3.bf16.msra.mxu1 %v7973_v9 }
 0x646   : > { %7999 = vmatprep.subr.bf16.mxu1 %v8488_v0  ;;  %v5364_v45 = vand.u32 4294901760, %v5363_v44 }
 0x648   : > { %7693 = vmatmul.mubr.f32.vlgmr.msra.gmra.mrb[14].mxu1 %v5362_v43  ;;  %7660 = vmatmul.mubr.f32.vlgmr.msra.gmra.mrb[10].mxu0 %v5364_v45  ;;  %v8318_v43 = vld [vmem:[%s521_s19] sm:$0xff]  ;;  %s6868_s19 = scalar_lea.sflag [#allocation4], %s8752_s8 }
 0x649   : > { %7983 = vmatpush3.bf16.msra.mxu0 %v7982_v28  ;;  %8001 = vmatpush3.bf16.msra.mxu1 %v7970_v27  ;;  %v7000_v45 = vld [vmem:[%s9499_s26] ss:$0 sm:$0xff] }
 0x64a   : > { %7984 = vmatprep.subr.bf16.mxu0 %v8488_v0  ;;  %8002 = vmatprep.subr.bf16.mxu1 %v8488_v0 }
 0x64b   : > { %7681 = vmatprep.mubr.msk.f32.mxu0 %vm8489_vm0, %v8490_v1  ;;  %7714 = vmatprep.mubr.msk.f32.mxu1 %vm8489_vm0, %v8490_v1 }
 0x64d   : > { %7986 = vmatpush3.bf16.msra.mxu0 %v7985_v31  ;;  %8004 = vmatpush3.bf16.msra.mxu1 %v7973_v9 }
 0x64e   : > { %7993 = vmatprep.subr.bf16.mxu0 %v8488_v0  ;;  %8041 = vmatprep.subr.bf16.mxu1 %v8488_v0 }
 0x650   : > { %7682 = vmatmul.mubr.f32.vlgmr.msra.gmra.mrb[12].mxu0 %v5361_v42  ;;  %7715 = vmatmul.mubr.f32.vlgmr.msra.gmra.mrb[16].mxu1 %v5360_v41  ;;  %v6999_v42 = vld [vmem:[%s9454_s12] ss:$0 sm:$0xff] }
 0x651   : > { %7995 = vmatpush3.bf16.msra.mxu0 %v7994_v32  ;;  %7703 = vmatprep.mubr.msk.f32.mxu0 %vm8489_vm0, %v8490_v1 }
 0x652   : > { %7996 = vmatprep.subr.bf16.mxu0 %v8488_v0  ;;  %7799 = vmatprep.mubr.msk.f32.mxu1 %vm8489_vm0, %v8490_v1 }
 0x653   : > { %8043 = vmatpush3.bf16.msra.mxu1 %v9230_v21 }
 0x654   : > { %8044 = vmatprep.subr.bf16.mxu1 %v8488_v0 }
 0x655   : > { %7998 = vmatpush3.bf16.msra.mxu0 %v7997_v33 }
 0x656   : > { %8005 = vmatprep.subr.bf16.mxu0 %v8488_v0 }
 0x658   : > { %7704 = vmatmul.mubr.f32.vlgmr.msra.gmra.mrb[14].mxu0 %v5360_v41 }
 0x659   : > { %7725 = vmatprep.mubr.msk.f32.mxu0 %vm8489_vm0, %v8490_v1  ;;  %8007 = vmatpush3.bf16.msra.mxu0 %v9196_v50 }
 0x65a   : > { %8008 = vmatprep.subr.bf16.mxu0 %v8488_v0 }
 0x65d   : > { %8010 = vmatpush3.bf16.msra.mxu0 %v9206_v59 }
 0x65e   : > { %8011 = vmatprep.subr.bf16.mxu0 %v8488_v0 }
 0x713   : > { %v5457_v24 = vpop.f32.mrb[12].mxu1 }
 0x714   : > { %v7672_v25 = vpop.f32.mrb[13].mxu1 }
 0x71b   : > { %v5614_v27 = vpop.f32.mrb[14].mxu1  ;;  %v5366_v9 = vpop.f32.mrb[10].mxu0 }
 0x71c   : > { %v5367_v28 = vadd.f32 %v6998_v26, %v5366_v9  ;;  %v7694_v29 = vpop.f32.mrb[15].mxu1  ;;  %v7661_v30 = vpop.f32.mrb[11].mxu0 }
 0x71d   : > { %v6433_v30 = vand.u32 4294901760, %v9319_v11 }
 0x71e   : > { %v5458_v31 = vadd.f32 %v5457_v24, %v5367_v28 }
 0x723   : > { %v5537_v32 = vpop.f32.mrb[12].mxu0  ;;  %v5772_v33 = vpop.f32.mrb[16].mxu1 }
 0x724   : > { %v5538_v34 = vadd.f32 %v5537_v32, %v5458_v31  ;;  %v7683_v35 = vpop.f32.mrb[13].mxu0  ;;  %v7716_v36 = vpop.f32.mrb[17].mxu1 }
 0x726   : > { %v5615_v37 = vadd.f32 %v5614_v27, %v5538_v34 }
 0x72b   : > { %v5697_v38 = vpop.f32.mrb[14].mxu0 }
 0x72c   : > { %v5698_v39 = vadd.f32 %v5697_v38, %v5615_v37  ;;  %v7705_v40 = vpop.f32.mrb[15].mxu0 }
 0x72e   : > { %v5773_v41 = vadd.f32 %v5772_v33, %v5698_v39  ;;  %v6434_v33 = vsub.f32 %v9319_v11, %v6433_v30 }
 0x730   : > { %v5776_v44 = vadd.f32 %v8318_v43, %v5773_v41  ;;  %v6435_v35 = vand.u32 4294901760, %v6434_v33 }
 0x732   : > { %v5784_v46 = vmul.f32 %v6999_v42, %v5776_v44  ;;  %v8066_v44 = vpack.c.bf16 %v9234_v23, %v9232_v22 }
 0x734   : > { %v9249_v47 = vadd.f32 %v7000_v45, %v5784_v46 }
 0x736   : > { %v5805_v48 = vsel %vm602_vm1, %v9249_v47, 0 }
 0x737   : > { %v5876_v49 = vand.u32 4294901760, %v5805_v48 }
 0x739   : > { %v5877_v51 = vsub.f32 %v5805_v48, %v5876_v49 }
 0x73b   : > { %v5878_v52 = vand.u32 4294901760, %v5877_v51 }
 0x73d   : > { %v5879_v53 = vsub.f32 %v5877_v51, %v5878_v52 }
 0x73f   : > { %v5880_v54 = vand.u32 4294901760, %v5879_v53 }
 0x741   : > { %7726 = vmatmul.mubr.f32.vlgmr.msra.gmra.mrb[16].mxu0 %v5880_v54  ;;  %v7001_v54 = vld [vmem:[%s9500_s14] ss:$0 sm:$0xff]  ;;  %s9505_s14 = sld [smem:[#allocation26_spill]] }
 0x742   : > { %8013 = vmatpush3.bf16.msra.mxu0 %v8012_v8  ;;  %7736 = vmatprep.mubr.msk.f32.mxu0 %vm8489_vm0, %v8490_v1  ;;  %v9315_v8 = vsub.f32 %v6296_v55, %v6322_v57 }
 0x743   : > { %8014 = vmatprep.subr.bf16.mxu0 %v8488_v0 }
 0x744   : > { %v6419_v24 = vand.u32 4294901760, %v9315_v8 }
 0x746   : > { %8016 = vmatpush3.bf16.msra.mxu0 %v8015_v12  ;;  %v9322_v12 = vsub.f32 %v6299_v2, %v6331_v4  ;;  %v6420_v27 = vsub.f32 %v9315_v8, %v6419_v24 }
 0x747   : > { %8017 = vmatprep.subr.bf16.mxu0 %v8488_v0  ;;  %s9397_s26 = scalar_lea.hbm %s9505_s14, %s7006_s29 }
 0x748   : > { %v6421_v28 = vand.u32 4294901760, %v6420_v27  ;;  %v6440_v36 = vand.u32 4294901760, %v9322_v12 }
 0x749   : > { %7737 = vmatmul.mubr.f32.vlgmr.msra.gmra.mrb[16].mxu0 %v5876_v49 }
 0x74a   : > { %8019 = vmatpush3.bf16.msra.mxu0 %v8018_v13  ;;  %7747 = vmatprep.mubr.msk.f32.mxu0 %vm8489_vm0, %v8490_v1  ;;  %v9324_v13 = vsub.f32 %v6300_v3, %v6334_v5  ;;  %v6441_v39 = vsub.f32 %v9322_v12, %v6440_v36  ;;  %v7002_v3 = vld [vmem:[%s9501_s28] ss:$0 sm:$0xff]  ;;  %s8407_s28 = scalar_lea.vmem %s9399_s9, 128 }
 0x74b   : > { %8020 = vmatprep.subr.bf16.mxu0 %v8488_v0  ;;  %p8408_p10 = scmp.ne.s32.totalorder %s9399_s9, %s8407_s28  ;;  %p8415_p2 = scmp.lt.s32.totalorder %s8413_s13, %s8407_s28 }
 0x74c   : > { %v6447_v37 = vand.u32 4294901760, %v9324_v13  ;;  %v6442_v41 = vand.u32 4294901760, %v6441_v39  ;;  %v8075_v48 = vpack.c.bf16 %v9324_v13, %v9322_v12 }
 0x74d   : > { %p8409_p3 = pnand %p8408_p10, %p9506_p13  ;;  %p8416_p5 = por %p8415_p2, %p8414_p9 }
 0x74e   : > { %8022 = vmatpush3.bf16.msra.mxu0 %v8021_v14  ;;  %v6398_v14 = vand.u32 4294901760, %v9232_v22  ;;  %v6448_v40 = vsub.f32 %v9324_v13, %v6447_v37  ;;  %v8099_v53 = vpack.c.bf16 %v6447_v37, %v6440_v36 }
 0x74f   : > { %8023 = vmatprep.subr.bf16.mxu0 %v8488_v0  ;;  %p8410_p7 = pneg %p8409_p3 }
 0x750   : > { %v6449_v42 = vand.u32 4294901760, %v6448_v40 }
 0x751   : > { %7748 = vmatmul.mubr.f32.vlgmr.msra.gmra.mrb[16].mxu0 %v5877_v51  ;;  %p8417_p1 = pnand %p8416_p5, %p8410_p7 }
 0x752   : > { %8025 = vmatpush3.bf16.msra.mxu0 %v9196_v50  ;;  %7758 = vmatprep.mubr.msk.f32.mxu0 %vm8489_vm0, %v8490_v1  ;;  %v8063_v43 = vpack.c.bf16 %v6449_v42, %v6442_v41 }
 0x753   : > { %8026 = vmatprep.subr.bf16.mxu0 %v8488_v0 }
 0x756   : > { %8028 = vmatpush3.bf16.msra.mxu0 %v9206_v59 }
 0x757   : > { %8029 = vmatprep.subr.bf16.mxu0 %v8488_v0 }
 0x759   : > { %7759 = vmatmul.mubr.f32.vlgmr.msra.gmra.mrb[16].mxu0 %v5878_v52 }
 0x75a   : > { %8031 = vmatpush3.bf16.msra.mxu0 %v8030_v15  ;;  %7769 = vmatprep.mubr.msk.f32.mxu0 %vm8489_vm0, %v8490_v1  ;;  %v6405_v15 = vand.u32 4294901760, %v9234_v23 }
 0x75b   : > { %8032 = vmatprep.subr.bf16.mxu0 %v8488_v0 }
 0x75c   : > { %v6406_v17 = vsub.f32 %v9234_v23, %v6405_v15 }
 0x75e   : > { %8034 = vmatpush3.bf16.msra.mxu0 %v8033_v16  ;;  %v6399_v16 = vsub.f32 %v9232_v22, %v6398_v14  ;;  %v6407_v19 = vand.u32 4294901760, %v6406_v17  ;;  %v7003_v17 = vld [vmem:[%s9503_s0] ss:$0 sm:$0xff] }
 0x75f   : > { %8035 = vmatprep.subr.bf16.mxu0 %v8488_v0 }
 0x760   : > { %v6400_v18 = vand.u32 4294901760, %v6399_v16 }
 0x761   : > { %7770 = vmatmul.mubr.f32.vlgmr.msra.gmra.mrb[16].mxu0 %v5876_v49 }
 0x762   : > { %8037 = vmatpush3.bf16.msra.mxu0 %v9196_v50  ;;  %7780 = vmatprep.mubr.msk.f32.mxu0 %vm8489_vm0, %v8490_v1  ;;  %v6295_v50 = vld [vmem:[%s9452_s10 + $0x10] sm:$0xff]  ;;  %v8054_v25 = vpack.c.bf16 %v6407_v19, %v6400_v18  ;;  %v7004_v19 = vld [vmem:[%s9504_s21] ss:$0 sm:$0xff] }
 0x763   : > { %8038 = vmatprep.subr.bf16.mxu0 %v8488_v0  ;;  %v6319_v56 = vand.u32 4294901760, %v6295_v50 }
 0x765   : > { %v9287_v58 = vpack.c.bf16 %v6322_v57, %v6319_v56  ;;  %v9313_v7 = vsub.f32 %v6295_v50, %v6319_v56 }
 0x766   : > { %8040 = vmatpush3.bf16.msra.mxu0 %v9206_v59  ;;  %v6297_v59 = vld [vmem:[%s9452_s10 + $0x20] sm:$0xff] }
 0x767   : > { %8077 = vmatprep.subr.bf16.mxu0 %v8488_v0  ;;  %8046 = vmatpush3.bf16.msra.mxu1 %v9287_v58  ;;  %v6325_v61 = vand.u32 4294901760, %v6297_v59  ;;  %v6412_v20 = vand.u32 4294901760, %v9313_v7  ;;  %v8069_v45 = vpack.c.bf16 %v9315_v8, %v9313_v7 }
 0x768   : > { %8047 = vmatprep.subr.bf16.mxu1 %v8488_v0 }
 0x769   : > { %7781 = vmatmul.mubr.f32.vlgmr.msra.gmra.mrb[16].mxu0 %v5876_v49  ;;  %v9299_v63 = vpack.c.bf16 %v6328_v62, %v6325_v61  ;;  %v9317_v10 = vsub.f32 %v6297_v59, %v6325_v61  ;;  %v6413_v26 = vsub.f32 %v9313_v7, %v6412_v20  ;;  %v8090_v49 = vpack.c.bf16 %v6405_v15, %v6398_v14 }
 0x76a   : > { %8079 = vmatpush3.bf16.msra.mxu0 %v9230_v21  ;;  %7856 = vmatprep.mubr.msk.f32.mxu0 %vm8489_vm0, %v8490_v1  ;;  %v8093_v51 = vpack.c.bf16 %v6419_v24, %v6412_v20 }
 0x76b   : > { %8080 = vmatprep.subr.bf16.mxu0 %v8488_v0  ;;  %8049 = vmatpush3.bf16.msra.mxu1 %v9299_v63  ;;  %v6414_v9 = vand.u32 4294901760, %v6413_v26  ;;  %v6426_v29 = vand.u32 4294901760, %v9317_v10  ;;  %v8072_v46 = vpack.c.bf16 %v9319_v11, %v9317_v10 }
 0x76c   : > { %8050 = vmatprep.subr.bf16.mxu1 %v8488_v0 }
 0x76d   : > { %v8057_v31 = vpack.c.bf16 %v6421_v28, %v6414_v9  ;;  %v6427_v32 = vsub.f32 %v9317_v10, %v6426_v29  ;;  %v8096_v52 = vpack.c.bf16 %v6433_v30, %v6426_v29 }
 0x76e   : > { %8082 = vmatpush3.bf16.msra.mxu0 %v9287_v58 }
 0x76f   : > { %8083 = vmatprep.subr.bf16.mxu0 %v8488_v0  ;;  %8052 = vmatpush3.bf16.msra.mxu1 %v9311_v6  ;;  %v6428_v34 = vand.u32 4294901760, %v6427_v32 }
 0x770   : > { %8053 = vmatprep.subr.bf16.mxu1 %v8488_v0 }
 0x771   : > { %v8060_v38 = vpack.c.bf16 %v6435_v35, %v6428_v34 }
 0x772   : > { %8085 = vmatpush3.bf16.msra.mxu0 %v9299_v63 }
 0x773   : > { %8086 = vmatprep.subr.bf16.mxu0 %v8488_v0 }
 0x776   : > { %8088 = vmatpush3.bf16.msra.mxu0 %v9311_v6 }
 0x777   : > { %8101 = vmatprep.subr.bf16.mxu0 %v8488_v0 }
 0x83c   : > { %v6288_v50 = vpop.f32.mrb[16].mxu0 }
 0x83d   : > { %v8116_v55 = vadd.f32 %v7001_v54, %v6288_v50  ;;  %v7782_v22 = vpop.f32.mrb[17].mxu0 }
 0x83f   : > { %v6292_v23 = vmax.f32 %v8116_v55, 0.0 }
 0x841   : > { %v6310_v56 = vsel %vm6308_vm5, %v6292_v23, 0 }
 0x842   : > { %v6385_v57 = vand.u32 4294901760, %v6310_v56 }
 0x844   : > { %v6386_v59 = vsub.f32 %v6310_v56, %v6385_v57 }
 0x846   : > { %v6387_v60 = vand.u32 4294901760, %v6386_v59 }
 0x848   : > { %7857 = vmatmul.mubr.f32.vlgmr.msra.gmra.mrb[18].mxu0 %v6387_v60  ;;  %v6388_v61 = vsub.f32 %v6386_v59, %v6387_v60 }
 0x849   : > { %8103 = vmatpush3.bf16.msra.mxu0 %v9230_v21  ;;  %7894 = vmatprep.mubr.msk.f32.mxu0 %vm8489_vm0, %v8490_v1 }
 0x84a   : > { %8104 = vmatprep.subr.bf16.mxu0 %v8488_v0  ;;  %v6389_v62 = vand.u32 4294901760, %v6388_v61 }
 0x84c   : > { %7800 = vmatmul.mubr.f32.vlgmr.msra.gmra.mrb[18].mxu1 %v6389_v62 }
 0x84d   : > { %8055 = vmatpush3.bf16.msra.mxu1 %v8054_v25  ;;  %8106 = vmatpush3.bf16.msra.mxu0 %v9287_v58 }
 0x84e   : > { %8056 = vmatprep.subr.bf16.mxu1 %v8488_v0  ;;  %8107 = vmatprep.subr.bf16.mxu0 %v8488_v0 }
 0x84f   : > { %7818 = vmatprep.mubr.msk.f32.mxu1 %vm8489_vm0, %v8490_v1 }
 0x851   : > { %8058 = vmatpush3.bf16.msra.mxu1 %v8057_v31  ;;  %8109 = vmatpush3.bf16.msra.mxu0 %v9299_v63 }
 0x852   : > { %8059 = vmatprep.subr.bf16.mxu1 %v8488_v0  ;;  %8110 = vmatprep.subr.bf16.mxu0 %v8488_v0 }
 0x855   : > { %8061 = vmatpush3.bf16.msra.mxu1 %v8060_v38  ;;  %8112 = vmatpush3.bf16.msra.mxu0 %v9311_v6 }
 0x856   : > { %8062 = vmatprep.subr.bf16.mxu1 %v8488_v0 }
 0x858   : > { %7895 = vmatmul.mubr.f32.vlgmr.msra.gmra.mrb[20].mxu0 %v6385_v57 }
 0x859   : > { %8064 = vmatpush3.bf16.msra.mxu1 %v8063_v43 }
 0x85a   : > { %8065 = vmatprep.subr.bf16.mxu1 %v8488_v0 }
 0x85c   : > { %7819 = vmatmul.mubr.f32.vlgmr.msra.gmra.mrb[20].mxu1 %v6385_v57 }
 0x85d   : > { %8067 = vmatpush3.bf16.msra.mxu1 %v8066_v44  ;;  %7837 = vmatprep.mubr.msk.f32.mxu1 %vm8489_vm0, %v8490_v1 }
 0x85e   : > { %8068 = vmatprep.subr.bf16.mxu1 %v8488_v0 }
 0x861   : > { %8070 = vmatpush3.bf16.msra.mxu1 %v8069_v45 }
 0x862   : > { %8071 = vmatprep.subr.bf16.mxu1 %v8488_v0 }
 0x865   : > { %8073 = vmatpush3.bf16.msra.mxu1 %v8072_v46 }
 0x866   : > { %8074 = vmatprep.subr.bf16.mxu1 %v8488_v0 }
 0x869   : > { %8076 = vmatpush3.bf16.msra.mxu1 %v8075_v48 }
 0x86a   : > { %8089 = vmatprep.subr.bf16.mxu1 %v8488_v0 }
 0x86c   : > { %7838 = vmatmul.mubr.f32.vlgmr.msra.gmra.mrb[22].mxu1 %v6386_v59 }
 0x86d   : > { %8091 = vmatpush3.bf16.msra.mxu1 %v8090_v49  ;;  %7875 = vmatprep.mubr.msk.f32.mxu1 %vm8489_vm0, %v8490_v1 }
 0x86e   : > { %8092 = vmatprep.subr.bf16.mxu1 %v8488_v0 }
 0x871   : > { %8094 = vmatpush3.bf16.msra.mxu1 %v8093_v51 }
 0x872   : > { %8095 = vmatprep.subr.bf16.mxu1 %v8488_v0 }
 0x875   : > { %8097 = vmatpush3.bf16.msra.mxu1 %v8096_v52 }
 0x876   : > { %8098 = vmatprep.subr.bf16.mxu1 %v8488_v0 }
 0x879   : > { %8100 = vmatpush3.bf16.msra.mxu1 %v8099_v53 }
 0x87c   : > { %7876 = vmatmul.mubr.f32.vlgmr.msra.gmra.mrb[24].mxu1 %v6385_v57 }
 0x91b   : > { %v6671_v21 = vpop.f32.mrb[18].mxu0 }
 0x91c   : > { %v7858_v58 = vpop.f32.mrb[19].mxu0 }
 0x91f   : > { %v6391_v63 = vpop.f32.mrb[18].mxu1 }
 0x920   : > { %v7801_v2 = vpop.f32.mrb[19].mxu1  ;;  %v6392_v5 = vadd.f32 %v7002_v3, %v6391_v63 }
 0x92b   : > { %v6845_v4 = vpop.f32.mrb[20].mxu0 }
 0x92c   : > { %v7896_v1 = vpop.f32.mrb[21].mxu0 }
 0x92f   : > { %v6502_v6 = vpop.f32.mrb[20].mxu1 }
 0x930   : > { %v6503_v7 = vadd.f32 %v6502_v6, %v6392_v5  ;;  %v7820_v8 = vpop.f32.mrb[21].mxu1 }
 0x93f   : > { %v6590_v10 = vpop.f32.mrb[22].mxu1 }
 0x940   : > { %v6591_v0 = vadd.f32 %v6590_v10, %v6503_v7  ;;  %v7839_v11 = vpop.f32.mrb[23].mxu1 }
 0x942   : > { %v6672_v12 = vadd.f32 %v6671_v21, %v6591_v0 }
 0x94f   : > { %v6766_v13 = vpop.f32.mrb[24].mxu1 }
 0x950   : > { %v6767_v14 = vadd.f32 %v6766_v13, %v6672_v12  ;;  %v7877_v15 = vpop.f32.mrb[25].mxu1 }
 0x952   : > { %v6846_v16 = vadd.f32 %v6845_v4, %v6767_v14 }
 0x954   : > { %v6849_v18 = vadd.f32 %v6846_v16, %v9249_v47 }
 0x956   : > { %v6857_v20 = vmul.f32 %v7003_v17, %v6849_v18 }
 0x958   : > { %v6865_v24 = vadd.f32 %v7004_v19, %v6857_v20 }
 0x95a   : > { %6866 = vst.msk [vmem:[%s587_s16] sm:$0xff] %vm602_vm1, %v6865_v24 }
 0x95b   : > { %8420 = shalt.err (!%p8417_p1)
}
 0x95c   : > { %s8421_s8 = scalar_lea.hbm %s9397_s26, 128  ;;  %s8425_s20 = scalar_lea.hbm %s9505_s14, 256 }
 0x95d   : > { %p8422_p6 = scmp.ne.s32.totalorder %s9397_s26, %s8421_s8  ;;  %p8426_p12 = scmp.lt.u32.totalorder %s9397_s26, %s9505_s14 }
 0x95e   : > { %p8427_p11 = scmp.lt.u32.totalorder %s8425_s20, %s8421_s8  ;;  %p8429_p10 = scmp.lt.u32.totalorder %s8421_s8, %s9397_s26 }
 0x95f   : > { %p8423_p8 = pnand %p8422_p6, %p9506_p13 }
 0x960   : > { %p8428_p0 = por %p8427_p11, %p8426_p12 }
 0x961   : > { %p8424_p4 = pneg %p8423_p8 }
 0x962   : > { %p8430_p3 = por %p8429_p10, %p8428_p0 }
 0x964   : > { %p8431_p7 = pnand %p8430_p3, %p8424_p4 }
 0x966   : > { %8434 = shalt.err (!%p8431_p7)
}
 0x967   : > { %8233 = dma.vmem_to_hbm [thread:$0]  (%p9506_p13), %s9399_s9, 128, %s9397_s26, %s6868_s19  }
 0x968 PF: > { %s9507_s29 = sld [smem:[#allocation13_spill]]  ;;  %s9508_s16 = sld [smem:[#allocation15_spill]] }
 0x969   : > { %p9510_p2 = scmp.ge.s32.totalorder %s8481_s24, 2 }
 0x96e   : > { %s6893_s27 = sand.u32 1, %s9507_s29   ;;  %p9509_p9 = scmp.ne.s32.totalorder %s9508_s16, 0 }
 0x96f   : > { %s6894_s18 = scalar_lea.sflag [#allocation4], %s6893_s27 }
 0x970   : > { %p8247_p5 = pnand %p9510_p2, %p9509_p9 }
 0x972   : > { %8464 = dma.done.wait (!%p8247_p5), %s6894_s18, 128  }
 0x973   : > { %8466 = vsyncadd (!%p8247_p5), %s6894_s18, 4294967168  ;;  %s9511_s24 = sld [smem:[#allocation16_spill]]  ;;  %s9512_s28 = sld [smem:[#allocation14_spill]] }
 0x974   : > { %s9513_s23 = sld [smem:[#allocation17_spill]]  ;;  %s9514_s21 = smov %s8473_s22 }
 0x979   : > { %p32_p1 = scmp.ge.s32.totalorder %s9511_s24, 4   ;;  %s9515_s22 = smov %s9512_s28 }
 0x97b   :  { %34 = sbr.rel (!%p32_p1) target bundleno = 16 (0x10), region = 146 }
 0x982   :  { %6899 = vsyncpa [#allocation3], 1 }
 0x983   :  { %6901 = vsyncpa [#allocation3 + $0x1], 1 }
 0x984   :  { %6902 = vsyncpa [#allocation6], 1 }
 0x985   :  { %6904 = vsyncpa [#allocation6 + $0x1], 1 }
 0x986   :  { %6905 = vsyncpa [#allocation4], 1 }
 0x987   :  { %6907 = vsyncpa [#allocation4 + $0x1], 1 }

</bundles_post_ra>
